<compile_context>
chip_gen: v7x
topology: tpu7x:2x2x1
jax: 0.10.0
libtpu: 0.0.40
codegen_flags: <defaults>
</compile_context>

<pallas_src>
import math

import jax
import jax.numpy as jnp
from jax import lax
from jax.experimental import pallas as pl
from jax.experimental.pallas import tpu as pltpu

LANES = 128                      # channel lanes carried between layers
VMEM_LIMIT = 32 * 1024 * 1024    # >= default scoped VMEM on v5e/v6e/v7x
BLOCK_ROWS = 1024                # row tile for the 1x1 (matmul) kernels


def _round_up(x, m):
    return (x + m - 1) // m * m


def _pick_tile_rows(m, block_rows=BLOCK_ROWS):
    """Large 8-aligned row tiles; keep >=2 grid steps when possible (v7x)."""
    tm = min(block_rows, _round_up(m, 8))
    if tm >= m and m > 8:
        tm = _round_up(pl.cdiv(m, 2), 8)
    return max(tm, 8)


# ---------------------------------------------------------------------------
# Conv2d 3x3 / stride 2 / pad 1 (no bias) + BatchNorm(eval) + ReLU
# ---------------------------------------------------------------------------

def _conv3x3_s2_bn_relu(x_nhwc, w_groups, scale_p, shift_p,
                        *, out_dtype=jnp.bfloat16):
    """The padded input is space-to-depth'd (2x2 parity planes stacked on the
    lane axis) wrapper-side, so every tap of the 3x3 becomes a contiguous
    (h,w)-shifted in-kernel slice; the 9 taps collapse into 4 matmuls of
    K = 4*Cin accumulated in an f32 VMEM scratch.  Grid is one image per step
    (parallel across TensorCores)."""
    n, h, w, c = x_nhwc.shape
    assert h % 2 == 0 and w % 2 == 0
    ho, wo = h // 2, w // 2
    wop = _round_up(wo, 8)          # in-kernel row flatten needs 8-aligned W
    kin = 4 * c
    cp = w_groups.shape[-1]

    # Zero padding (conv pad + right pad for the 8-aligned width) followed by
    # space-to-depth.  XLA fuses this into one ~1x relayout of the activation
    # (vs. the 2.25x im2col patch matrix it replaces).
    xp = jnp.pad(x_nhwc, ((0, 0), (1, 1), (1, 1 + 2 * (wop - wo)), (0, 0)))
    planes = [xp[:, ph::2, pw::2, :] for ph in (0, 1) for pw in (0, 1)]
    s2d = jnp.concatenate(planes, axis=-1).astype(jnp.bfloat16)
    # s2d: (N, ho + 1, wop + 1, 4*C)

    def kernel(x_ref, w_ref, sc_ref, sh_ref, o_ref, acc_ref):
        first = True
        for dh in (0, 1):
            for dw in (0, 1):
                a = x_ref[0, dh:dh + ho, dw:dw + wop, :].reshape(ho * wop, kin)
                part = jnp.dot(a, w_ref[2 * dh + dw],
                               preferred_element_type=jnp.float32)
                if first:
                    acc_ref[...] = part
                    first = False
                else:
                    acc_ref[...] += part
        out = jnp.maximum(acc_ref[...] * sc_ref[...] + sh_ref[...], 0.0)
        out = out.reshape(ho, wop, cp)[:, :wo, :]       # drop width padding
        o_ref[0] = out.astype(o_ref.dtype)

    return pl.pallas_call(
        kernel,
        out_shape=jax.ShapeDtypeStruct((n, ho, wo, cp), out_dtype),
        grid=(n,),
        in_specs=[
            pl.BlockSpec((1, ho + 1, wop + 1, kin), lambda i: (i, 0, 0, 0)),
            pl.BlockSpec((4, kin, cp), lambda i: (0, 0, 0)),
            pl.BlockSpec((1, cp), lambda i: (0, 0)),
            pl.BlockSpec((1, cp), lambda i: (0, 0)),
        ],
        out_specs=pl.BlockSpec((1, ho, wo, cp), lambda i: (i, 0, 0, 0)),
        scratch_shapes=[pltpu.VMEM((ho * wop, cp), jnp.float32)],
        compiler_params=pltpu.CompilerParams(
            dimension_semantics=("parallel",),
            vmem_limit_bytes=VMEM_LIMIT),
    )(s2d, w_groups, scale_p, shift_p)


# ---------------------------------------------------------------------------
# Conv2d 1x1 (no bias) + BatchNorm(eval) + ReLU  (row-tiled matmul)
# ---------------------------------------------------------------------------

def _conv1x1_bn_relu(x_rows, w_p, scale_p, shift_p, *, out_dtype=jnp.bfloat16):
    m, kin = x_rows.shape
    cp = w_p.shape[-1]
    tm = _pick_tile_rows(m)

    def kernel(a_ref, w_ref, sc_ref, sh_ref, o_ref):
        acc = jnp.dot(a_ref[...], w_ref[...], preferred_element_type=jnp.float32)
        o_ref[...] = jnp.maximum(acc * sc_ref[...] + sh_ref[...],
                                 0.0).astype(o_ref.dtype)

    return pl.pallas_call(
        kernel,
        out_shape=jax.ShapeDtypeStruct((m, cp), out_dtype),
        grid=(pl.cdiv(m, tm),),
        in_specs=[
            pl.BlockSpec((tm, kin), lambda i: (i, 0)),
            pl.BlockSpec((kin, cp), lambda i: (0, 0)),
            pl.BlockSpec((1, cp), lambda i: (0, 0)),
            pl.BlockSpec((1, cp), lambda i: (0, 0)),
        ],
        out_specs=pl.BlockSpec((tm, cp), lambda i: (i, 0)),
        compiler_params=pltpu.CompilerParams(
            dimension_semantics=("parallel",),
            vmem_limit_bytes=VMEM_LIMIT),
    )(x_rows, w_p, scale_p, shift_p)


def _concat_conv1x1_bn_relu(a_rows, b_rows, wa_p, wb_p, scale_p, shift_p,
                            *, out_dtype=jnp.float32):
    """stem_3: channel concat fused into the 1x1 conv (two inputs, K split)."""
    m, ka = a_rows.shape
    _, kb = b_rows.shape
    cp = wa_p.shape[-1]
    tm = _pick_tile_rows(m)

    def kernel(a_ref, b_ref, wa_ref, wb_ref, sc_ref, sh_ref, o_ref):
        acc = jnp.dot(a_ref[...], wa_ref[...], preferred_element_type=jnp.float32)
        acc = acc + jnp.dot(b_ref[...], wb_ref[...],
                            preferred_element_type=jnp.float32)
        o_ref[...] = jnp.maximum(acc * sc_ref[...] + sh_ref[...],
                                 0.0).astype(o_ref.dtype)

    return pl.pallas_call(
        kernel,
        out_shape=jax.ShapeDtypeStruct((m, cp), out_dtype),
        grid=(pl.cdiv(m, tm),),
        in_specs=[
            pl.BlockSpec((tm, ka), lambda i: (i, 0)),
            pl.BlockSpec((tm, kb), lambda i: (i, 0)),
            pl.BlockSpec((ka, cp), lambda i: (0, 0)),
            pl.BlockSpec((kb, cp), lambda i: (0, 0)),
            pl.BlockSpec((1, cp), lambda i: (0, 0)),
            pl.BlockSpec((1, cp), lambda i: (0, 0)),
        ],
        out_specs=pl.BlockSpec((tm, cp), lambda i: (i, 0)),
        compiler_params=pltpu.CompilerParams(
            dimension_semantics=("parallel",),
            vmem_limit_bytes=VMEM_LIMIT),
    )(a_rows, b_rows, wa_p, wb_p, scale_p, shift_p)


# ---------------------------------------------------------------------------
# MaxPool2d(kernel_size=2, stride=2)  (NHWC, reads the activation directly)
# ---------------------------------------------------------------------------

def _maxpool2x2(x_nhwc):
    n, h, w, c = x_nhwc.shape
    ho, wo = h // 2, w // 2
    # Free reshape: fold width pairs into lanes (C is already 128-lane padded).
    x2 = x_nhwc.reshape(n, h, wo, 2 * c)

    def kernel(x_ref, o_ref):
        x = x_ref[0]                                     # (2*ho, wo, 2*c)
        colmax = jnp.maximum(x[:, :, :c], x[:, :, c:])   # max over width pairs
        colmax = colmax.reshape(ho, 2, wo, c)
        o_ref[0] = jnp.maximum(colmax[:, 0], colmax[:, 1])   # over row pairs

    return pl.pallas_call(
        kernel,
        out_shape=jax.ShapeDtypeStruct((n, ho, wo, c), x_nhwc.dtype),
        grid=(n,),
        in_specs=[pl.BlockSpec((1, h, wo, 2 * c), lambda i: (i, 0, 0, 0))],
        out_specs=pl.BlockSpec((1, ho, wo, c), lambda i: (i, 0, 0, 0)),
        compiler_params=pltpu.CompilerParams(
            dimension_semantics=("parallel",),
            vmem_limit_bytes=VMEM_LIMIT),
    )(x2)


# ---------------------------------------------------------------------------
# One-time weight / BN layout preparation (hoisted out of the forward path)
# ---------------------------------------------------------------------------

def prepare_stem_params(params, *, eps=1e-5):
    """All inter-layer activations carry LANES (=128) channels; padded channels
    keep zero weights AND zero scale/shift so they stay exactly zero.  BN scale
    is NOT folded into the bf16 weights -- it is applied in the f32 epilogue."""
    def bn(gamma, beta, mean, var):
        scale = gamma / jnp.sqrt(var + eps)
        shift = beta - mean * scale
        cout = gamma.shape[0]
        sc = jnp.zeros((1, LANES), jnp.float32).at[0, :cout].set(scale)
        sh = jnp.zeros((1, LANES), jnp.float32).at[0, :cout].set(shift)
        return sc, sh

    def w1x1(w_oihw, kin):
        cout, cin = w_oihw.shape[0], w_oihw.shape[1]
        wm = jnp.transpose(w_oihw[:, :, 0, 0], (1, 0))           # (cin, cout)
        out = jnp.zeros((kin, LANES), jnp.float32).at[:cin, :cout].set(wm)
        return out.astype(jnp.bfloat16)

    def w3x3_groups(w_oihw, c_act):
        # Group-stacked weights for the space-to-depth formulation:
        # group g=(dh,dw) uses parity plane b=(ph,pw) rows, tap (2dh+ph, 2dw+pw).
        cout, cin = w_oihw.shape[0], w_oihw.shape[1]
        taps = jnp.transpose(w_oihw, (2, 3, 1, 0))               # (3,3,cin,cout)
        wg = jnp.zeros((4, 4 * c_act, LANES), jnp.float32)
        for dh in range(2):
            for dw in range(2):
                for ph in range(2):
                    for pw in range(2):
                        kh, kw = 2 * dh + ph, 2 * dw + pw
                        if kh < 3 and kw < 3:
                            b = 2 * ph + pw
                            wg = wg.at[2 * dh + dw,
                                       b * c_act:b * c_act + cin,
                                       :cout].set(taps[kh, kw])
        return wg.astype(jnp.bfloat16)

    w1, g1, b1, m1, v1 = params["stem_1"]
    w2a, g2a, b2a, m2a, v2a = params["stem_2a"]
    w2b, g2b, b2b, m2b, v2b = params["stem_2b"]
    w3, g3, b3, m3, v3 = params["stem_3"]

    nif = w1.shape[0]
    # stem_3 consumes cat([stem_2b_out, stem_2p_out], channels): split its 1x1
    # weight along the input channels so the concat can be fused in-kernel.
    w3a, w3b = w3[:, :nif], w3[:, nif:]

    return {
        "stem_1": (w3x3_groups(w1, w1.shape[1]),) + bn(g1, b1, m1, v1),
        "stem_2a": (w1x1(w2a, LANES),) + bn(g2a, b2a, m2a, v2a),
        "stem_2b": (w3x3_groups(w2b, LANES),) + bn(g2b, b2b, m2b, v2b),
        "stem_3": (w1x1(w3a, LANES), w1x1(w3b, LANES)) + bn(g3, b3, m3, v3),
    }


# ---------------------------------------------------------------------------
# StemBlock forward (NCHW in / NCHW out), matching the PyTorch module
# ---------------------------------------------------------------------------

def stem_block_forward(x_nchw, prepared, *, out_channels):
    p = prepared
    x = jnp.transpose(x_nchw, (0, 2, 3, 1)).astype(jnp.bfloat16)   # NHWC
    s1 = _conv3x3_s2_bn_relu(x, *p["stem_1"])          # (N, H/2, W/2, 128)
    n, h2, w2, cp = s1.shape
    s2a_rows = _conv1x1_bn_relu(s1.reshape(n * h2 * w2, cp), *p["stem_2a"])
    s2a = s2a_rows.reshape(n, h2, w2, cp)
    s2b = _conv3x3_s2_bn_relu(s2a, *p["stem_2b"])      # (N, H/4, W/4, 128)
    s2p = _maxpool2x2(s1)                              # (N, H/4, W/4, 128)
    _, h4, w4, _ = s2b.shape
    m = n * h4 * w4
    out_rows = _concat_conv1x1_bn_relu(                # concat fused in-kernel
        s2b.reshape(m, cp), s2p.reshape(m, cp), *p["stem_3"],
        out_dtype=jnp.float32)
    out = out_rows.reshape(n, h4, w4, cp)[..., :out_channels]
    return jnp.transpose(out, (0, 3, 1, 2))            # NCHW


# ---------------------------------------------------------------------------
# Pure-JAX f32 reference (PyTorch semantics)
# ---------------------------------------------------------------------------

def _conv_bn_relu_ref(x, w, gamma, beta, mean, var, stride, pad, eps=1e-5):
    y = lax.conv_general_dilated(
        x.astype(jnp.float32), w.astype(jnp.float32),
        window_strides=(stride, stride), padding=((pad, pad), (pad, pad)),
        dimension_numbers=("NCHW", "OIHW", "NCHW"))
    s = gamma / jnp.sqrt(var + eps)
    y = y * s[None, :, None, None] + (beta - mean * s)[None, :, None, None]
    return jnp.maximum(y, 0.0)


def _stem_block_reference(x, params):
    s1 = _conv_bn_relu_ref(x, *params["stem_1"], 2, 1)
    s2a = _conv_bn_relu_ref(s1, *params["stem_2a"], 1, 0)
    s2b = _conv_bn_relu_ref(s2a, *params["stem_2b"], 2, 1)
    s2p = lax.reduce_window(s1, -jnp.inf, lax.max,
                            (1, 1, 2, 2), (1, 1, 2, 2), "VALID")
    cat = jnp.concatenate([s2b, s2p], axis=1)
    return _conv_bn_relu_ref(cat, *params["stem_3"], 1, 0)


def _make_cbr_params(key, cin, cout, k):
    kw, kg, kb, km, kv = jax.random.split(key, 5)
    w = jax.random.normal(kw, (cout, cin, k, k), jnp.float32)
    w = w * (1.0 / math.sqrt(cin * k * k))
    gamma = 1.0 + 0.1 * jax.random.normal(kg, (cout,), jnp.float32)
    beta = 0.1 * jax.random.normal(kb, (cout,), jnp.float32)
    mean = 0.05 * jax.random.normal(km, (cout,), jnp.float32)
    var = jnp.abs(jax.random.normal(kv, (cout,), jnp.float32)) + 0.5
    return (w, gamma, beta, mean, var)


if __name__ == "__main__":
    key = jax.random.PRNGKey(0)
    k_x, k1, k2, k3, k4 = jax.random.split(key, 5)

    N, INP, NIF, H, W = 2, 3, 32, 16, 16

    x = jax.random.normal(k_x, (N, INP, H, W), dtype=jnp.float32)
    params = {
        "stem_1": _make_cbr_params(k1, INP, NIF, 3),        # 3x3 s2 p1
        "stem_2a": _make_cbr_params(k2, NIF, NIF // 2, 1),  # 1x1 s1 p0
        "stem_2b": _make_cbr_params(k3, NIF // 2, NIF, 3),  # 3x3 s2 p1
        "stem_3": _make_cbr_params(k4, 2 * NIF, NIF, 1),    # 1x1 s1 p0
    }

    prepared = prepare_stem_params(params)   # hoisted: once per params set
    fwd = jax.jit(stem_block_forward, static_argnames=("out_channels",))
    out = jax.block_until_ready(fwd(x, prepared, out_channels=NIF))

    ref = _stem_block_reference(x, params)
    assert out.shape == (N, NIF, H // 4, W // 4), out.shape
    max_err = float(jnp.max(jnp.abs(out - ref)))
    # bf16 activation/weight data path -> loosened tolerance vs f32 reference.
    assert jnp.allclose(out, ref, atol=5e-2, rtol=5e-2), (
        f"mismatch vs reference (max abs err {max_err})")

    print("KERNEL_OK")
</pallas_src>

<mosaic_0001>
module attributes {stable_mosaic.version = 11 : i64} {
  func.func @kernel(%arg0: i32, %arg1: memref<64x128xbf16, #tpu.memory_space<vmem>>, %arg2: memref<128x128xbf16, #tpu.memory_space<vmem>>, %arg3: memref<1x128xf32, #tpu.memory_space<vmem>>, %arg4: memref<1x128xf32, #tpu.memory_space<vmem>>, %arg5: memref<64x128xbf16, #tpu.memory_space<vmem>>) attributes {dimension_semantics = [#tpu.dimension_semantics<parallel>], iteration_bounds = array<i64: 2>, scalar_prefetch = 0 : i64, scratch_operands = 0 : i64, tpu.core_type = #tpu.core_type<tc>, window_params = [{transform_indices = @transform_0, window_bounds = array<i64: 64, 128>}, {pipeline_mode = #tpu.pipeline_mode<synchronous>, transform_indices = @transform_1, window_bounds = array<i64: 128, 128>}, {pipeline_mode = #tpu.pipeline_mode<synchronous>, transform_indices = @transform_2, window_bounds = array<i64: 1, 128>}, {pipeline_mode = #tpu.pipeline_mode<synchronous>, transform_indices = @transform_3, window_bounds = array<i64: 1, 128>}, {transform_indices = @transform_4, window_bounds = array<i64: 64, 128>}]} {
    %c0 = arith.constant 0 : index
    %c0_0 = arith.constant 0 : index
    %0 = vector.load %arg1[%c0, %c0_0] : memref<64x128xbf16, #tpu.memory_space<vmem>>, vector<64x128xbf16>
    %c0_1 = arith.constant 0 : index
    %c0_2 = arith.constant 0 : index
    %1 = vector.load %arg2[%c0_1, %c0_2] : memref<128x128xbf16, #tpu.memory_space<vmem>>, vector<128x128xbf16>
    %cst = arith.constant dense<0.000000e+00> : vector<64x128xf32>
    %2 = tpu.matmul %0, %1, %cst {dimension_numbers = #tpu.dot_dimension_numbers<[1], [0], [0], [1], [0, 0, 1, 1], [], []>} : vector<64x128xbf16>, vector<128x128xbf16>, vector<64x128xf32> -> vector<64x128xf32>
    %c0_3 = arith.constant 0 : index
    %c0_4 = arith.constant 0 : index
    %3 = vector.load %arg3[%c0_3, %c0_4] : memref<1x128xf32, #tpu.memory_space<vmem>>, vector<1x128xf32>
    %4 = vector.broadcast %3 : vector<1x128xf32> to vector<64x128xf32>
    %5 = arith.mulf %2, %4 : vector<64x128xf32>
    %c0_5 = arith.constant 0 : index
    %c0_6 = arith.constant 0 : index
    %6 = vector.load %arg4[%c0_5, %c0_6] : memref<1x128xf32, #tpu.memory_space<vmem>>, vector<1x128xf32>
    %7 = vector.broadcast %6 : vector<1x128xf32> to vector<64x128xf32>
    %8 = arith.addf %5, %7 : vector<64x128xf32>
    %cst_7 = arith.constant 0.000000e+00 : f32
    %9 = vector.broadcast %cst_7 : f32 to vector<64x128xf32>
    %10 = arith.maximumf %8, %9 : vector<64x128xf32>
    %11 = arith.truncf %10 : vector<64x128xf32> to vector<64x128xbf16>
    %c0_8 = arith.constant 0 : index
    %c0_9 = arith.constant 0 : index
    %12 = vector.load %arg5[%c0_8, %c0_9] : memref<64x128xbf16, #tpu.memory_space<vmem>>, vector<64x128xbf16>
    tpu.vector_store %arg5[%c0_8, %c0_9], %11 {strides = array<i32>} : memref<64x128xbf16, #tpu.memory_space<vmem>>, vector<64x128xbf16>,
    return
  }
  func.func @transform_0(%arg0: i32) -> (i32, i32) {
    %c0_i32 = arith.constant 0 : i32
    %c0_i32_0 = arith.constant 0 : i32
    return %arg0, %c0_i32 : i32, i32
  }
  func.func @transform_1(%arg0: i32) -> (i32, i32) {
    %c0_i32 = arith.constant 0 : i32
    %c0_i32_0 = arith.constant 0 : i32
    %c0_i32_1 = arith.constant 0 : i32
    return %c0_i32, %c0_i32_0 : i32, i32
  }
  func.func @transform_2(%arg0: i32) -> (i32, i32) {
    %c0_i32 = arith.constant 0 : i32
    %c0_i32_0 = arith.constant 0 : i32
    %c0_i32_1 = arith.constant 0 : i32
    return %c0_i32, %c0_i32_0 : i32, i32
  }
  func.func @transform_3(%arg0: i32) -> (i32, i32) {
    %c0_i32 = arith.constant 0 : i32
    %c0_i32_0 = arith.constant 0 : i32
    %c0_i32_1 = arith.constant 0 : i32
    return %c0_i32, %c0_i32_0 : i32, i32
  }
  func.func @transform_4(%arg0: i32) -> (i32, i32) {
    %c0_i32 = arith.constant 0 : i32
    %c0_i32_0 = arith.constant 0 : i32
    return %arg0, %c0_i32 : i32, i32
  }
}

module attributes {stable_mosaic.version = 11 : i64} {
  func.func @kernel(%arg0: i32, %arg1: memref<1x9x9x12xbf16, #tpu.memory_space<vmem>>, %arg2: memref<4x12x128xbf16, #tpu.memory_space<vmem>>, %arg3: memref<1x128xf32, #tpu.memory_space<vmem>>, %arg4: memref<1x128xf32, #tpu.memory_space<vmem>>, %arg5: memref<1x8x8x128xbf16, #tpu.memory_space<vmem>>, %arg6: memref<64x128xf32, #tpu.memory_space<vmem>>) attributes {dimension_semantics = [#tpu.dimension_semantics<parallel>], iteration_bounds = array<i64: 2>, scalar_prefetch = 0 : i64, scratch_operands = 1 : i64, tpu.core_type = #tpu.core_type<tc>, window_params = [{transform_indices = @transform_0, window_bounds = array<i64: 1, 9, 9, 12>}, {pipeline_mode = #tpu.pipeline_mode<synchronous>, transform_indices = @transform_1, window_bounds = array<i64: 4, 12, 128>}, {pipeline_mode = #tpu.pipeline_mode<synchronous>, transform_indices = @transform_2, window_bounds = array<i64: 1, 128>}, {pipeline_mode = #tpu.pipeline_mode<synchronous>, transform_indices = @transform_3, window_bounds = array<i64: 1, 128>}, {transform_indices = @transform_4, window_bounds = array<i64: 1, 8, 8, 128>}]} {
    %c0 = arith.constant 0 : index
    %c0_0 = arith.constant 0 : index
    %c0_1 = arith.constant 0 : index
    %c0_2 = arith.constant 0 : index
    %0 = vector.load %arg1[%c0, %c0_0, %c0_1, %c0_2] : memref<1x9x9x12xbf16, #tpu.memory_space<vmem>>, vector<1x8x8x12xbf16>
    %1 = vector.shape_cast %0 : vector<1x8x8x12xbf16> to vector<8x8x12xbf16>
    %2 = vector.shape_cast %1 : vector<8x8x12xbf16> to vector<64x12xbf16>
    %c0_3 = arith.constant 0 : index
    %c0_4 = arith.constant 0 : index
    %c0_5 = arith.constant 0 : index
    %3 = vector.load %arg2[%c0_3, %c0_4, %c0_5] : memref<4x12x128xbf16, #tpu.memory_space<vmem>>, vector<1x12x128xbf16>
    %4 = vector.shape_cast %3 : vector<1x12x128xbf16> to vector<12x128xbf16>
    %cst = arith.constant dense<0.000000e+00> : vector<64x128xf32>
    %5 = tpu.matmul %2, %4, %cst {dimension_numbers = #tpu.dot_dimension_numbers<[1], [0], [0], [1], [0, 0, 1, 1], [], []>} : vector<64x12xbf16>, vector<12x128xbf16>, vector<64x128xf32> -> vector<64x128xf32>
    %c0_6 = arith.constant 0 : index
    %c0_7 = arith.constant 0 : index
    %6 = vector.load %arg6[%c0_6, %c0_7] : memref<64x128xf32, #tpu.memory_space<vmem>>, vector<64x128xf32>
    tpu.vector_store %arg6[%c0_6, %c0_7], %5 {strides = array<i32>} : memref<64x128xf32, #tpu.memory_space<vmem>>, vector<64x128xf32>,
    %c0_8 = arith.constant 0 : index
    %c0_9 = arith.constant 0 : index
    %c1 = arith.constant 1 : index
    %c0_10 = arith.constant 0 : index
    %7 = vector.load %arg1[%c0_8, %c0_9, %c1, %c0_10] : memref<1x9x9x12xbf16, #tpu.memory_space<vmem>>, vector<1x8x8x12xbf16>
    %8 = vector.shape_cast %7 : vector<1x8x8x12xbf16> to vector<8x8x12xbf16>
    %9 = vector.shape_cast %8 : vector<8x8x12xbf16> to vector<64x12xbf16>
    %c1_11 = arith.constant 1 : index
    %c0_12 = arith.constant 0 : index
    %c0_13 = arith.constant 0 : index
    %10 = vector.load %arg2[%c1_11, %c0_12, %c0_13] : memref<4x12x128xbf16, #tpu.memory_space<vmem>>, vector<1x12x128xbf16>
    %11 = vector.shape_cast %10 : vector<1x12x128xbf16> to vector<12x128xbf16>
    %cst_14 = arith.constant dense<0.000000e+00> : vector<64x128xf32>
    %12 = tpu.matmul %9, %11, %cst_14 {dimension_numbers = #tpu.dot_dimension_numbers<[1], [0], [0], [1], [0, 0, 1, 1], [], []>} : vector<64x12xbf16>, vector<12x128xbf16>, vector<64x128xf32> -> vector<64x128xf32>
    %c0_15 = arith.constant 0 : index
    %c0_16 = arith.constant 0 : index
    %13 = vector.load %arg6[%c0_15, %c0_16] : memref<64x128xf32, #tpu.memory_space<vmem>>, vector<64x128xf32>
    %14 = arith.addf %13, %12 : vector<64x128xf32>
    %c0_17 = arith.constant 0 : index
    %c0_18 = arith.constant 0 : index
    %15 = vector.load %arg6[%c0_17, %c0_18] : memref<64x128xf32, #tpu.memory_space<vmem>>, vector<64x128xf32>
    tpu.vector_store %arg6[%c0_17, %c0_18], %14 {strides = array<i32>} : memref<64x128xf32, #tpu.memory_space<vmem>>, vector<64x128xf32>,
    %c0_19 = arith.constant 0 : index
    %c1_20 = arith.constant 1 : index
    %c0_21 = arith.constant 0 : index
    %c0_22 = arith.constant 0 : index
    %16 = vector.load %arg1[%c0_19, %c1_20, %c0_21, %c0_22] : memref<1x9x9x12xbf16, #tpu.memory_space<vmem>>, vector<1x8x8x12xbf16>
    %17 = vector.shape_cast %16 : vector<1x8x8x12xbf16> to vector<8x8x12xbf16>
    %18 = vector.shape_cast %17 : vector<8x8x12xbf16> to vector<64x12xbf16>
    %c2 = arith.constant 2 : index
    %c0_23 = arith.constant 0 : index
    %c0_24 = arith.constant 0 : index
    %19 = vector.load %arg2[%c2, %c0_23, %c0_24] : memref<4x12x128xbf16, #tpu.memory_space<vmem>>, vector<1x12x128xbf16>
    %20 = vector.shape_cast %19 : vector<1x12x128xbf16> to vector<12x128xbf16>
    %cst_25 = arith.constant dense<0.000000e+00> : vector<64x128xf32>
    %21 = tpu.matmul %18, %20, %cst_25 {dimension_numbers = #tpu.dot_dimension_numbers<[1], [0], [0], [1], [0, 0, 1, 1], [], []>} : vector<64x12xbf16>, vector<12x128xbf16>, vector<64x128xf32> -> vector<64x128xf32>
    %c0_26 = arith.constant 0 : index
    %c0_27 = arith.constant 0 : index
    %22 = vector.load %arg6[%c0_26, %c0_27] : memref<64x128xf32, #tpu.memory_space<vmem>>, vector<64x128xf32>
    %23 = arith.addf %22, %21 : vector<64x128xf32>
    %c0_28 = arith.constant 0 : index
    %c0_29 = arith.constant 0 : index
    %24 = vector.load %arg6[%c0_28, %c0_29] : memref<64x128xf32, #tpu.memory_space<vmem>>, vector<64x128xf32>
    tpu.vector_store %arg6[%c0_28, %c0_29], %23 {strides = array<i32>} : memref<64x128xf32, #tpu.memory_space<vmem>>, vector<64x128xf32>,
    %c0_30 = arith.constant 0 : index
    %c1_31 = arith.constant 1 : index
    %c1_32 = arith.constant 1 : index
    %c0_33 = arith.constant 0 : index
    %25 = vector.load %arg1[%c0_30, %c1_31, %c1_32, %c0_33] : memref<1x9x9x12xbf16, #tpu.memory_space<vmem>>, vector<1x8x8x12xbf16>
    %26 = vector.shape_cast %25 : vector<1x8x8x12xbf16> to vector<8x8x12xbf16>
    %27 = vector.shape_cast %26 : vector<8x8x12xbf16> to vector<64x12xbf16>
    %c3 = arith.constant 3 : index
    %c0_34 = arith.constant 0 : index
    %c0_35 = arith.constant 0 : index
    %28 = vector.load %arg2[%c3, %c0_34, %c0_35] : memref<4x12x128xbf16, #tpu.memory_space<vmem>>, vector<1x12x128xbf16>
    %29 = vector.shape_cast %28 : vector<1x12x128xbf16> to vector<12x128xbf16>
    %cst_36 = arith.constant dense<0.000000e+00> : vector<64x128xf32>
    %30 = tpu.matmul %27, %29, %cst_36 {dimension_numbers = #tpu.dot_dimension_numbers<[1], [0], [0], [1], [0, 0, 1, 1], [], []>} : vector<64x12xbf16>, vector<12x128xbf16>, vector<64x128xf32> -> vector<64x128xf32>
    %c0_37 = arith.constant 0 : index
    %c0_38 = arith.constant 0 : index
    %31 = vector.load %arg6[%c0_37, %c0_38] : memref<64x128xf32, #tpu.memory_space<vmem>>, vector<64x128xf32>
    %32 = arith.addf %31, %30 : vector<64x128xf32>
    %c0_39 = arith.constant 0 : index
    %c0_40 = arith.constant 0 : index
    %33 = vector.load %arg6[%c0_39, %c0_40] : memref<64x128xf32, #tpu.memory_space<vmem>>, vector<64x128xf32>
    tpu.vector_store %arg6[%c0_39, %c0_40], %32 {strides = array<i32>} : memref<64x128xf32, #tpu.memory_space<vmem>>, vector<64x128xf32>,
    %c0_41 = arith.constant 0 : index
    %c0_42 = arith.constant 0 : index
    %34 = vector.load %arg6[%c0_41, %c0_42] : memref<64x128xf32, #tpu.memory_space<vmem>>, vector<64x128xf32>
    %c0_43 = arith.constant 0 : index
    %c0_44 = arith.constant 0 : index
    %35 = vector.load %arg3[%c0_43, %c0_44] : memref<1x128xf32, #tpu.memory_space<vmem>>, vector<1x128xf32>
    %36 = vector.broadcast %35 : vector<1x128xf32> to vector<64x128xf32>
    %37 = arith.mulf %34, %36 : vector<64x128xf32>
    %c0_45 = arith.constant 0 : index
    %c0_46 = arith.constant 0 : index
    %38 = vector.load %arg4[%c0_45, %c0_46] : memref<1x128xf32, #tpu.memory_space<vmem>>, vector<1x128xf32>
    %39 = vector.broadcast %38 : vector<1x128xf32> to vector<64x128xf32>
    %40 = arith.addf %37, %39 : vector<64x128xf32>
    %cst_47 = arith.constant 0.000000e+00 : f32
    %41 = vector.broadcast %cst_47 : f32 to vector<64x128xf32>
    %42 = arith.maximumf %40, %41 : vector<64x128xf32>
    %43 = vector.shape_cast %42 : vector<64x128xf32> to vector<8x8x128xf32>
    %44 = arith.truncf %43 : vector<8x8x128xf32> to vector<8x8x128xbf16>
    %c0_48 = arith.constant 0 : index
    %c0_49 = arith.constant 0 : index
    %c0_50 = arith.constant 0 : index
    %c0_51 = arith.constant 0 : index
    %45 = vector.load %arg5[%c0_48, %c0_49, %c0_50, %c0_51] : memref<1x8x8x128xbf16, #tpu.memory_space<vmem>>, vector<1x8x8x128xbf16>
    %46 = vector.shape_cast %45 : vector<1x8x8x128xbf16> to vector<8x8x128xbf16>
    %47 = vector.shape_cast %44 : vector<8x8x128xbf16> to vector<1x8x8x128xbf16>
    tpu.vector_store %arg5[%c0_48, %c0_49, %c0_50, %c0_51], %47 {strides = array<i32>} : memref<1x8x8x128xbf16, #tpu.memory_space<vmem>>, vector<1x8x8x128xbf16>,
    return
  }
  func.func @transform_0(%arg0: i32) -> (i32, i32, i32, i32) {
    %c0_i32 = arith.constant 0 : i32
    %c0_i32_0 = arith.constant 0 : i32
    %c0_i32_1 = arith.constant 0 : i32
    %c0_i32_2 = arith.constant 0 : i32
    return %arg0, %c0_i32, %c0_i32_0, %c0_i32_1 : i32, i32, i32, i32
  }
  func.func @transform_1(%arg0: i32) -> (i32, i32, i32) {
    %c0_i32 = arith.constant 0 : i32
    %c0_i32_0 = arith.constant 0 : i32
    %c0_i32_1 = arith.constant 0 : i32
    %c0_i32_2 = arith.constant 0 : i32
    return %c0_i32, %c0_i32_0, %c0_i32_1 : i32, i32, i32
  }
  func.func @transform_2(%arg0: i32) -> (i32, i32) {
    %c0_i32 = arith.constant 0 : i32
    %c0_i32_0 = arith.constant 0 : i32
    %c0_i32_1 = arith.constant 0 : i32
    return %c0_i32, %c0_i32_0 : i32, i32
  }
  func.func @transform_3(%arg0: i32) -> (i32, i32) {
    %c0_i32 = arith.constant 0 : i32
    %c0_i32_0 = arith.constant 0 : i32
    %c0_i32_1 = arith.constant 0 : i32
    return %c0_i32, %c0_i32_0 : i32, i32
  }
  func.func @transform_4(%arg0: i32) -> (i32, i32, i32, i32) {
    %c0_i32 = arith.constant 0 : i32
    %c0_i32_0 = arith.constant 0 : i32
    %c0_i32_1 = arith.constant 0 : i32
    %c0_i32_2 = arith.constant 0 : i32
    return %arg0, %c0_i32, %c0_i32_0, %c0_i32_1 : i32, i32, i32, i32
  }
}

module attributes {stable_mosaic.version = 11 : i64} {
  func.func @kernel(%arg0: i32, %arg1: memref<1x5x9x512xbf16, #tpu.memory_space<vmem>>, %arg2: memref<4x512x128xbf16, #tpu.memory_space<vmem>>, %arg3: memref<1x128xf32, #tpu.memory_space<vmem>>, %arg4: memref<1x128xf32, #tpu.memory_space<vmem>>, %arg5: memref<1x4x4x128xbf16, #tpu.memory_space<vmem>>, %arg6: memref<32x128xf32, #tpu.memory_space<vmem>>) attributes {dimension_semantics = [#tpu.dimension_semantics<parallel>], iteration_bounds = array<i64: 2>, scalar_prefetch = 0 : i64, scratch_operands = 1 : i64, tpu.core_type = #tpu.core_type<tc>, window_params = [{transform_indices = @transform_0, window_bounds = array<i64: 1, 5, 9, 512>}, {pipeline_mode = #tpu.pipeline_mode<synchronous>, transform_indices = @transform_1, window_bounds = array<i64: 4, 512, 128>}, {pipeline_mode = #tpu.pipeline_mode<synchronous>, transform_indices = @transform_2, window_bounds = array<i64: 1, 128>}, {pipeline_mode = #tpu.pipeline_mode<synchronous>, transform_indices = @transform_3, window_bounds = array<i64: 1, 128>}, {transform_indices = @transform_4, window_bounds = array<i64: 1, 4, 4, 128>}]} {
    %c0 = arith.constant 0 : index
    %c0_0 = arith.constant 0 : index
    %c0_1 = arith.constant 0 : index
    %c0_2 = arith.constant 0 : index
    %0 = vector.load %arg1[%c0, %c0_0, %c0_1, %c0_2] : memref<1x5x9x512xbf16, #tpu.memory_space<vmem>>, vector<1x4x8x512xbf16>
    %1 = vector.shape_cast %0 : vector<1x4x8x512xbf16> to vector<4x8x512xbf16>
    %2 = vector.shape_cast %1 : vector<4x8x512xbf16> to vector<32x512xbf16>
    %c0_3 = arith.constant 0 : index
    %c0_4 = arith.constant 0 : index
    %c0_5 = arith.constant 0 : index
    %3 = vector.load %arg2[%c0_3, %c0_4, %c0_5] : memref<4x512x128xbf16, #tpu.memory_space<vmem>>, vector<1x512x128xbf16>
    %4 = vector.shape_cast %3 : vector<1x512x128xbf16> to vector<512x128xbf16>
    %cst = arith.constant dense<0.000000e+00> : vector<32x128xf32>
    %5 = tpu.matmul %2, %4, %cst {dimension_numbers = #tpu.dot_dimension_numbers<[1], [0], [0], [1], [0, 0, 1, 1], [], []>} : vector<32x512xbf16>, vector<512x128xbf16>, vector<32x128xf32> -> vector<32x128xf32>
    %c0_6 = arith.constant 0 : index
    %c0_7 = arith.constant 0 : index
    %6 = vector.load %arg6[%c0_6, %c0_7] : memref<32x128xf32, #tpu.memory_space<vmem>>, vector<32x128xf32>
    tpu.vector_store %arg6[%c0_6, %c0_7], %5 {strides = array<i32>} : memref<32x128xf32, #tpu.memory_space<vmem>>, vector<32x128xf32>,
    %c0_8 = arith.constant 0 : index
    %c0_9 = arith.constant 0 : index
    %c1 = arith.constant 1 : index
    %c0_10 = arith.constant 0 : index
    %7 = vector.load %arg1[%c0_8, %c0_9, %c1, %c0_10] : memref<1x5x9x512xbf16, #tpu.memory_space<vmem>>, vector<1x4x8x512xbf16>
    %8 = vector.shape_cast %7 : vector<1x4x8x512xbf16> to vector<4x8x512xbf16>
    %9 = vector.shape_cast %8 : vector<4x8x512xbf16> to vector<32x512xbf16>
    %c1_11 = arith.constant 1 : index
    %c0_12 = arith.constant 0 : index
    %c0_13 = arith.constant 0 : index
    %10 = vector.load %arg2[%c1_11, %c0_12, %c0_13] : memref<4x512x128xbf16, #tpu.memory_space<vmem>>, vector<1x512x128xbf16>
    %11 = vector.shape_cast %10 : vector<1x512x128xbf16> to vector<512x128xbf16>
    %cst_14 = arith.constant dense<0.000000e+00> : vector<32x128xf32>
    %12 = tpu.matmul %9, %11, %cst_14 {dimension_numbers = #tpu.dot_dimension_numbers<[1], [0], [0], [1], [0, 0, 1, 1], [], []>} : vector<32x512xbf16>, vector<512x128xbf16>, vector<32x128xf32> -> vector<32x128xf32>
    %c0_15 = arith.constant 0 : index
    %c0_16 = arith.constant 0 : index
    %13 = vector.load %arg6[%c0_15, %c0_16] : memref<32x128xf32, #tpu.memory_space<vmem>>, vector<32x128xf32>
    %14 = arith.addf %13, %12 : vector<32x128xf32>
    %c0_17 = arith.constant 0 : index
    %c0_18 = arith.constant 0 : index
    %15 = vector.load %arg6[%c0_17, %c0_18] : memref<32x128xf32, #tpu.memory_space<vmem>>, vector<32x128xf32>
    tpu.vector_store %arg6[%c0_17, %c0_18], %14 {strides = array<i32>} : memref<32x128xf32, #tpu.memory_space<vmem>>, vector<32x128xf32>,
    %c0_19 = arith.constant 0 : index
    %c1_20 = arith.constant 1 : index
    %c0_21 = arith.constant 0 : index
    %c0_22 = arith.constant 0 : index
    %16 = vector.load %arg1[%c0_19, %c1_20, %c0_21, %c0_22] : memref<1x5x9x512xbf16, #tpu.memory_space<vmem>>, vector<1x4x8x512xbf16>
    %17 = vector.shape_cast %16 : vector<1x4x8x512xbf16> to vector<4x8x512xbf16>
    %18 = vector.shape_cast %17 : vector<4x8x512xbf16> to vector<32x512xbf16>
    %c2 = arith.constant 2 : index
    %c0_23 = arith.constant 0 : index
    %c0_24 = arith.constant 0 : index
    %19 = vector.load %arg2[%c2, %c0_23, %c0_24] : memref<4x512x128xbf16, #tpu.memory_space<vmem>>, vector<1x512x128xbf16>
    %20 = vector.shape_cast %19 : vector<1x512x128xbf16> to vector<512x128xbf16>
    %cst_25 = arith.constant dense<0.000000e+00> : vector<32x128xf32>
    %21 = tpu.matmul %18, %20, %cst_25 {dimension_numbers = #tpu.dot_dimension_numbers<[1], [0], [0], [1], [0, 0, 1, 1], [], []>} : vector<32x512xbf16>, vector<512x128xbf16>, vector<32x128xf32> -> vector<32x128xf32>
    %c0_26 = arith.constant 0 : index
    %c0_27 = arith.constant 0 : index
    %22 = vector.load %arg6[%c0_26, %c0_27] : memref<32x128xf32, #tpu.memory_space<vmem>>, vector<32x128xf32>
    %23 = arith.addf %22, %21 : vector<32x128xf32>
    %c0_28 = arith.constant 0 : index
    %c0_29 = arith.constant 0 : index
    %24 = vector.load %arg6[%c0_28, %c0_29] : memref<32x128xf32, #tpu.memory_space<vmem>>, vector<32x128xf32>
    tpu.vector_store %arg6[%c0_28, %c0_29], %23 {strides = array<i32>} : memref<32x128xf32, #tpu.memory_space<vmem>>, vector<32x128xf32>,
    %c0_30 = arith.constant 0 : index
    %c1_31 = arith.constant 1 : index
    %c1_32 = arith.constant 1 : index
    %c0_33 = arith.constant 0 : index
    %25 = vector.load %arg1[%c0_30, %c1_31, %c1_32, %c0_33] : memref<1x5x9x512xbf16, #tpu.memory_space<vmem>>, vector<1x4x8x512xbf16>
    %26 = vector.shape_cast %25 : vector<1x4x8x512xbf16> to vector<4x8x512xbf16>
    %27 = vector.shape_cast %26 : vector<4x8x512xbf16> to vector<32x512xbf16>
    %c3 = arith.constant 3 : index
    %c0_34 = arith.constant 0 : index
    %c0_35 = arith.constant 0 : index
    %28 = vector.load %arg2[%c3, %c0_34, %c0_35] : memref<4x512x128xbf16, #tpu.memory_space<vmem>>, vector<1x512x128xbf16>
    %29 = vector.shape_cast %28 : vector<1x512x128xbf16> to vector<512x128xbf16>
    %cst_36 = arith.constant dense<0.000000e+00> : vector<32x128xf32>
    %30 = tpu.matmul %27, %29, %cst_36 {dimension_numbers = #tpu.dot_dimension_numbers<[1], [0], [0], [1], [0, 0, 1, 1], [], []>} : vector<32x512xbf16>, vector<512x128xbf16>, vector<32x128xf32> -> vector<32x128xf32>
    %c0_37 = arith.constant 0 : index
    %c0_38 = arith.constant 0 : index
    %31 = vector.load %arg6[%c0_37, %c0_38] : memref<32x128xf32, #tpu.memory_space<vmem>>, vector<32x128xf32>
    %32 = arith.addf %31, %30 : vector<32x128xf32>
    %c0_39 = arith.constant 0 : index
    %c0_40 = arith.constant 0 : index
    %33 = vector.load %arg6[%c0_39, %c0_40] : memref<32x128xf32, #tpu.memory_space<vmem>>, vector<32x128xf32>
    tpu.vector_store %arg6[%c0_39, %c0_40], %32 {strides = array<i32>} : memref<32x128xf32, #tpu.memory_space<vmem>>, vector<32x128xf32>,
    %c0_41 = arith.constant 0 : index
    %c0_42 = arith.constant 0 : index
    %34 = vector.load %arg6[%c0_41, %c0_42] : memref<32x128xf32, #tpu.memory_space<vmem>>, vector<32x128xf32>
    %c0_43 = arith.constant 0 : index
    %c0_44 = arith.constant 0 : index
    %35 = vector.load %arg3[%c0_43, %c0_44] : memref<1x128xf32, #tpu.memory_space<vmem>>, vector<1x128xf32>
    %36 = vector.broadcast %35 : vector<1x128xf32> to vector<32x128xf32>
    %37 = arith.mulf %34, %36 : vector<32x128xf32>
    %c0_45 = arith.constant 0 : index
    %c0_46 = arith.constant 0 : index
    %38 = vector.load %arg4[%c0_45, %c0_46] : memref<1x128xf32, #tpu.memory_space<vmem>>, vector<1x128xf32>
    %39 = vector.broadcast %38 : vector<1x128xf32> to vector<32x128xf32>
    %40 = arith.addf %37, %39 : vector<32x128xf32>
    %cst_47 = arith.constant 0.000000e+00 : f32
    %41 = vector.broadcast %cst_47 : f32 to vector<32x128xf32>
    %42 = arith.maximumf %40, %41 : vector<32x128xf32>
    %43 = vector.shape_cast %42 : vector<32x128xf32> to vector<4x8x128xf32>
    %44 = vector.extract_strided_slice %43 {offsets = [0, 0, 0], sizes = [4, 4, 128], strides = [1, 1, 1]} : vector<4x8x128xf32> to vector<4x4x128xf32>
    %45 = arith.truncf %44 : vector<4x4x128xf32> to vector<4x4x128xbf16>
    %c0_48 = arith.constant 0 : index
    %c0_49 = arith.constant 0 : index
    %c0_50 = arith.constant 0 : index
    %c0_51 = arith.constant 0 : index
    %46 = vector.load %arg5[%c0_48, %c0_49, %c0_50, %c0_51] : memref<1x4x4x128xbf16, #tpu.memory_space<vmem>>, vector<1x4x4x128xbf16>
    %47 = vector.shape_cast %46 : vector<1x4x4x128xbf16> to vector<4x4x128xbf16>
    %48 = vector.shape_cast %45 : vector<4x4x128xbf16> to vector<1x4x4x128xbf16>
    tpu.vector_store %arg5[%c0_48, %c0_49, %c0_50, %c0_51], %48 {strides = array<i32>} : memref<1x4x4x128xbf16, #tpu.memory_space<vmem>>, vector<1x4x4x128xbf16>,
    return
  }
  func.func @transform_0(%arg0: i32) -> (i32, i32, i32, i32) {
    %c0_i32 = arith.constant 0 : i32
    %c0_i32_0 = arith.constant 0 : i32
    %c0_i32_1 = arith.constant 0 : i32
    %c0_i32_2 = arith.constant 0 : i32
    return %arg0, %c0_i32, %c0_i32_0, %c0_i32_1 : i32, i32, i32, i32
  }
  func.func @transform_1(%arg0: i32) -> (i32, i32, i32) {
    %c0_i32 = arith.constant 0 : i32
    %c0_i32_0 = arith.constant 0 : i32
    %c0_i32_1 = arith.constant 0 : i32
    %c0_i32_2 = arith.constant 0 : i32
    return %c0_i32, %c0_i32_0, %c0_i32_1 : i32, i32, i32
  }
  func.func @transform_2(%arg0: i32) -> (i32, i32) {
    %c0_i32 = arith.constant 0 : i32
    %c0_i32_0 = arith.constant 0 : i32
    %c0_i32_1 = arith.constant 0 : i32
    return %c0_i32, %c0_i32_0 : i32, i32
  }
  func.func @transform_3(%arg0: i32) -> (i32, i32) {
    %c0_i32 = arith.constant 0 : i32
    %c0_i32_0 = arith.constant 0 : i32
    %c0_i32_1 = arith.constant 0 : i32
    return %c0_i32, %c0_i32_0 : i32, i32
  }
  func.func @transform_4(%arg0: i32) -> (i32, i32, i32, i32) {
    %c0_i32 = arith.constant 0 : i32
    %c0_i32_0 = arith.constant 0 : i32
    %c0_i32_1 = arith.constant 0 : i32
    %c0_i32_2 = arith.constant 0 : i32
    return %arg0, %c0_i32, %c0_i32_0, %c0_i32_1 : i32, i32, i32, i32
  }
}

module attributes {stable_mosaic.version = 11 : i64} {
  func.func @kernel(%arg0: i32, %arg1: memref<1x8x4x256xbf16, #tpu.memory_space<vmem>>, %arg2: memref<1x4x4x128xbf16, #tpu.memory_space<vmem>>) attributes {dimension_semantics = [#tpu.dimension_semantics<parallel>], iteration_bounds = array<i64: 2>, scalar_prefetch = 0 : i64, scratch_operands = 0 : i64, tpu.core_type = #tpu.core_type<tc>, window_params = [{transform_indices = @transform_0, window_bounds = array<i64: 1, 8, 4, 256>}, {transform_indices = @transform_1, window_bounds = array<i64: 1, 4, 4, 128>}]} {
    %c0 = arith.constant 0 : index
    %c0_0 = arith.constant 0 : index
    %c0_1 = arith.constant 0 : index
    %c0_2 = arith.constant 0 : index
    %0 = vector.load %arg1[%c0, %c0_0, %c0_1, %c0_2] : memref<1x8x4x256xbf16, #tpu.memory_space<vmem>>, vector<1x8x4x256xbf16>
    %1 = vector.shape_cast %0 : vector<1x8x4x256xbf16> to vector<8x4x256xbf16>
    %2 = vector.extract_strided_slice %1 {offsets = [0, 0, 0], sizes = [8, 4, 128], strides = [1, 1, 1]} : vector<8x4x256xbf16> to vector<8x4x128xbf16>
    %3 = vector.extract_strided_slice %1 {offsets = [0, 0, 128], sizes = [8, 4, 128], strides = [1, 1, 1]} : vector<8x4x256xbf16> to vector<8x4x128xbf16>
    %4 = arith.maximumf %2, %3 : vector<8x4x128xbf16>
    %5 = vector.shape_cast %4 : vector<8x4x128xbf16> to vector<4x2x4x128xbf16>
    %6 = vector.extract_strided_slice %5 {offsets = [0, 0, 0, 0], sizes = [4, 1, 4, 128], strides = [1, 1, 1, 1]} : vector<4x2x4x128xbf16> to vector<4x1x4x128xbf16>
    %7 = vector.shape_cast %6 : vector<4x1x4x128xbf16> to vector<4x4x128xbf16>
    %8 = vector.extract_strided_slice %5 {offsets = [0, 1, 0, 0], sizes = [4, 1, 4, 128], strides = [1, 1, 1, 1]} : vector<4x2x4x128xbf16> to vector<4x1x4x128xbf16>
    %9 = vector.shape_cast %8 : vector<4x1x4x128xbf16> to vector<4x4x128xbf16>
    %10 = arith.maximumf %7, %9 : vector<4x4x128xbf16>
    %c0_3 = arith.constant 0 : index
    %c0_4 = arith.constant 0 : index
    %c0_5 = arith.constant 0 : index
    %c0_6 = arith.constant 0 : index
    %11 = vector.load %arg2[%c0_3, %c0_4, %c0_5, %c0_6] : memref<1x4x4x128xbf16, #tpu.memory_space<vmem>>, vector<1x4x4x128xbf16>
    %12 = vector.shape_cast %11 : vector<1x4x4x128xbf16> to vector<4x4x128xbf16>
    %13 = vector.shape_cast %10 : vector<4x4x128xbf16> to vector<1x4x4x128xbf16>
    tpu.vector_store %arg2[%c0_3, %c0_4, %c0_5, %c0_6], %13 {strides = array<i32>} : memref<1x4x4x128xbf16, #tpu.memory_space<vmem>>, vector<1x4x4x128xbf16>,
    return
  }
  func.func @transform_0(%arg0: i32) -> (i32, i32, i32, i32) {
    %c0_i32 = arith.constant 0 : i32
    %c0_i32_0 = arith.constant 0 : i32
    %c0_i32_1 = arith.constant 0 : i32
    %c0_i32_2 = arith.constant 0 : i32
    return %arg0, %c0_i32, %c0_i32_0, %c0_i32_1 : i32, i32, i32, i32
  }
  func.func @transform_1(%arg0: i32) -> (i32, i32, i32, i32) {
    %c0_i32 = arith.constant 0 : i32
    %c0_i32_0 = arith.constant 0 : i32
    %c0_i32_1 = arith.constant 0 : i32
    %c0_i32_2 = arith.constant 0 : i32
    return %arg0, %c0_i32, %c0_i32_0, %c0_i32_1 : i32, i32, i32, i32
  }
}

module attributes {stable_mosaic.version = 11 : i64} {
  func.func @kernel(%arg0: i32, %arg1: memref<16x128xbf16, #tpu.memory_space<vmem>>, %arg2: memref<16x128xbf16, #tpu.memory_space<vmem>>, %arg3: memref<128x128xbf16, #tpu.memory_space<vmem>>, %arg4: memref<128x128xbf16, #tpu.memory_space<vmem>>, %arg5: memref<1x128xf32, #tpu.memory_space<vmem>>, %arg6: memref<1x128xf32, #tpu.memory_space<vmem>>, %arg7: memref<16x128xf32, #tpu.memory_space<vmem>>) attributes {dimension_semantics = [#tpu.dimension_semantics<parallel>], iteration_bounds = array<i64: 2>, scalar_prefetch = 0 : i64, scratch_operands = 0 : i64, tpu.core_type = #tpu.core_type<tc>, window_params = [{transform_indices = @transform_0, window_bounds = array<i64: 16, 128>}, {transform_indices = @transform_1, window_bounds = array<i64: 16, 128>}, {pipeline_mode = #tpu.pipeline_mode<synchronous>, transform_indices = @transform_2, window_bounds = array<i64: 128, 128>}, {pipeline_mode = #tpu.pipeline_mode<synchronous>, transform_indices = @transform_3, window_bounds = array<i64: 128, 128>}, {pipeline_mode = #tpu.pipeline_mode<synchronous>, transform_indices = @transform_4, window_bounds = array<i64: 1, 128>}, {pipeline_mode = #tpu.pipeline_mode<synchronous>, transform_indices = @transform_5, window_bounds = array<i64: 1, 128>}, {transform_indices = @transform_6, window_bounds = array<i64: 16, 128>}]} {
    %c0 = arith.constant 0 : index
    %c0_0 = arith.constant 0 : index
    %0 = vector.load %arg1[%c0, %c0_0] : memref<16x128xbf16, #tpu.memory_space<vmem>>, vector<16x128xbf16>
    %c0_1 = arith.constant 0 : index
    %c0_2 = arith.constant 0 : index
    %1 = vector.load %arg3[%c0_1, %c0_2] : memref<128x128xbf16, #tpu.memory_space<vmem>>, vector<128x128xbf16>
    %cst = arith.constant dense<0.000000e+00> : vector<16x128xf32>
    %2 = tpu.matmul %0, %1, %cst {dimension_numbers = #tpu.dot_dimension_numbers<[1], [0], [0], [1], [0, 0, 1, 1], [], []>} : vector<16x128xbf16>, vector<128x128xbf16>, vector<16x128xf32> -> vector<16x128xf32>
    %c0_3 = arith.constant 0 : index
    %c0_4 = arith.constant 0 : index
    %3 = vector.load %arg2[%c0_3, %c0_4] : memref<16x128xbf16, #tpu.memory_space<vmem>>, vector<16x128xbf16>
    %c0_5 = arith.constant 0 : index
    %c0_6 = arith.constant 0 : index
    %4 = vector.load %arg4[%c0_5, %c0_6] : memref<128x128xbf16, #tpu.memory_space<vmem>>, vector<128x128xbf16>
    %cst_7 = arith.constant dense<0.000000e+00> : vector<16x128xf32>
    %5 = tpu.matmul %3, %4, %cst_7 {dimension_numbers = #tpu.dot_dimension_numbers<[1], [0], [0], [1], [0, 0, 1, 1], [], []>} : vector<16x128xbf16>, vector<128x128xbf16>, vector<16x128xf32> -> vector<16x128xf32>
    %6 = arith.addf %2, %5 : vector<16x128xf32>
    %c0_8 = arith.constant 0 : index
    %c0_9 = arith.constant 0 : index
    %7 = vector.load %arg5[%c0_8, %c0_9] : memref<1x128xf32, #tpu.memory_space<vmem>>, vector<1x128xf32>
    %8 = vector.broadcast %7 : vector<1x128xf32> to vector<16x128xf32>
    %9 = arith.mulf %6, %8 : vector<16x128xf32>
    %c0_10 = arith.constant 0 : index
    %c0_11 = arith.constant 0 : index
    %10 = vector.load %arg6[%c0_10, %c0_11] : memref<1x128xf32, #tpu.memory_space<vmem>>, vector<1x128xf32>
    %11 = vector.broadcast %10 : vector<1x128xf32> to vector<16x128xf32>
    %12 = arith.addf %9, %11 : vector<16x128xf32>
    %cst_12 = arith.constant 0.000000e+00 : f32
    %13 = vector.broadcast %cst_12 : f32 to vector<16x128xf32>
    %14 = arith.maximumf %12, %13 : vector<16x128xf32>
    %c0_13 = arith.constant 0 : index
    %c0_14 = arith.constant 0 : index
    %15 = vector.load %arg7[%c0_13, %c0_14] : memref<16x128xf32, #tpu.memory_space<vmem>>, vector<16x128xf32>
    tpu.vector_store %arg7[%c0_13, %c0_14], %14 {strides = array<i32>} : memref<16x128xf32, #tpu.memory_space<vmem>>, vector<16x128xf32>,
    return
  }
  func.func @transform_0(%arg0: i32) -> (i32, i32) {
    %c0_i32 = arith.constant 0 : i32
    %c0_i32_0 = arith.constant 0 : i32
    return %arg0, %c0_i32 : i32, i32
  }
  func.func @transform_1(%arg0: i32) -> (i32, i32) {
    %c0_i32 = arith.constant 0 : i32
    %c0_i32_0 = arith.constant 0 : i32
    return %arg0, %c0_i32 : i32, i32
  }
  func.func @transform_2(%arg0: i32) -> (i32, i32) {
    %c0_i32 = arith.constant 0 : i32
    %c0_i32_0 = arith.constant 0 : i32
    %c0_i32_1 = arith.constant 0 : i32
    return %c0_i32, %c0_i32_0 : i32, i32
  }
  func.func @transform_3(%arg0: i32) -> (i32, i32) {
    %c0_i32 = arith.constant 0 : i32
    %c0_i32_0 = arith.constant 0 : i32
    %c0_i32_1 = arith.constant 0 : i32
    return %c0_i32, %c0_i32_0 : i32, i32
  }
  func.func @transform_4(%arg0: i32) -> (i32, i32) {
    %c0_i32 = arith.constant 0 : i32
    %c0_i32_0 = arith.constant 0 : i32
    %c0_i32_1 = arith.constant 0 : i32
    return %c0_i32, %c0_i32_0 : i32, i32
  }
  func.func @transform_5(%arg0: i32) -> (i32, i32) {
    %c0_i32 = arith.constant 0 : i32
    %c0_i32_0 = arith.constant 0 : i32
    %c0_i32_1 = arith.constant 0 : i32
    return %c0_i32, %c0_i32_0 : i32, i32
  }
  func.func @transform_6(%arg0: i32) -> (i32, i32) {
    %c0_i32 = arith.constant 0 : i32
    %c0_i32_0 = arith.constant 0 : i32
    return %arg0, %c0_i32 : i32, i32
  }
}

</mosaic_0001>

<bundles_post_ra>
// kernel: stem_block_forward.6
= control target key start
LH: loop header
LB: loop body
LE: loop exit
PB: predicated region body
PF: predicated region fallthrough
CT: control target
= control target key end

     0   :  { %s666_s15 = smov 0   ;;  %s726_s0 = inlined_call_operand.vmem [shape: bf16[128,128], index: 0, kind: input, shape index: {}]   ;;  %s727_s1 = inlined_call_operand.vmem [shape: bf16[128,128], index: 1, kind: input, shape index: {}]   ;;  %s728_s2 = inlined_call_operand.vmem [shape: f32[1,128], index: 2, kind: input, shape index: {}]   ;;  %s729_s3 = inlined_call_operand.vmem [shape: f32[1,128], index: 3, kind: input, shape index: {}]   ;;  %s730_s4 = inlined_call_operand.vmem [shape: bf16[128,128], index: 4, kind: output, shape index: {}]  }
   0x1 LB: > { %s497_s16 = sadd.s32 4294967295, %s639_s15   ;;  %p501_p0 = scmp.ge.s32.totalorder %s639_s15, 1  ;;  %s639_s15 = sphi %s666_s15, %s14_s15  }
   0x2   : > { %p163_p1 = scmp.lt.s32.totalorder %s639_s15, 3 }
   0x4   : > { %p164_p2 = pnand %p501_p0, %p163_p1 }
   0x5   : > { %v621_v0 = vld [vmem:[%s727_s1] sm:$0xff] (!%p164_p2)   ;;  %s502_s19 = sshll.u32 (!%p164_p2), %s497_s16, 3  ;;  %v622_v1 = vld [vmem:[%s727_s1 + $0x8] sm:$0xff] (!%p164_p2)   ;;  %v623_v2 = vld [vmem:[%s727_s1 + $0x10] sm:$0xff] (!%p164_p2)  }
   0x6   : > { %167 = sbr.rel (%p164_p2) target bundleno = 262 (0x106), region = 36  ;;  %p190_p3 = scmp.lt.s32.totalorder (!%p164_p2), %s502_s19, 15  ;;  %573 = vmatprep.subr.bf16.mxu0 (!%p164_p2), %v621_v0  ;;  %597 = vmatprep.subr.bf16.mxu1 (!%p164_p2), %v621_v0  ;;  %v624_v3 = vld [vmem:[%s727_s1 + $0x18] sm:$0xff] (!%p164_p2)   ;;  %v625_v6 = vld [vmem:[%s727_s1 + $0x20] sm:$0xff] (!%p164_p2)   ;;  %v626_v7 = vld [vmem:[%s727_s1 + $0x28] sm:$0xff] (!%p164_p2)  }
   0x7   : > { %574 = vmatpush3.bf16.msra.mxu0 (!%p164_p2), %v621_v0  ;;  %605 = vmatpush3.bf16.msra.mxu1 (!%p164_p2), %v621_v0  ;;  %v627_v8 = vld [vmem:[%s727_s1 + $0x30] sm:$0xff] (!%p164_p2)   ;;  %v628_v9 = vld [vmem:[%s727_s1 + $0x38] sm:$0xff] (!%p164_p2)   ;;  %v518_v12 = vld [vmem:[%s728_s2] ss:$0 sm:$0xff] (!%p164_p2) }
   0x8   : > { %575 = vmatprep.subr.bf16.mxu0 (!%p164_p2), %v622_v1  ;;  %598 = vmatprep.subr.bf16.mxu1 (!%p164_p2), %v622_v1  ;;  %v519_v14 = vld [vmem:[%s729_s3] ss:$0 sm:$0xff] (!%p164_p2) }
   0xb   : > { %576 = vmatpush3.bf16.msra.mxu0 (!%p164_p2), %v622_v1  ;;  %606 = vmatpush3.bf16.msra.mxu1 (!%p164_p2), %v622_v1 }
   0xc   : > { %577 = vmatprep.subr.bf16.mxu0 (!%p164_p2), %v623_v2  ;;  %599 = vmatprep.subr.bf16.mxu1 (!%p164_p2), %v623_v2 }
   0xd   : > { %s732_s19 = smov (!%p190_p3, %s502_s19), 15 }
   0xe   : > { %s503_s24 = sshll.u32 %s732_s19, 2 }
   0xf   : > { %s691_s27 = scalar_lea.vmem %s726_s0, %s503_s24  ;;  %578 = vmatpush3.bf16.msra.mxu0 %v623_v2  ;;  %607 = vmatpush3.bf16.msra.mxu1 %v623_v2  ;;  %s199_s20 = scalar_lea.vmem %s730_s4, %s503_s24 }
  0x10   : > { %v629_v4 = vld [vmem:[%s691_s27] sm:$0xff]   ;;  %v630_v5 = vld [vmem:[%s691_s27 + $0x10] sm:$0xff]   ;;  %579 = vmatprep.subr.bf16.mxu0 %v624_v3  ;;  %600 = vmatprep.subr.bf16.mxu1 %v624_v3  ;;  %v631_v10 = vld [vmem:[%s691_s27 + $0x8] sm:$0xff]  }
  0x11   : > { %589 = vmatprep.mubr.bf16.mxu0 %v629_v4  ;;  %593 = vmatprep.mubr.bf16.mxu1 %v630_v5  ;;  %v632_v11 = vld [vmem:[%s691_s27 + $0x18] sm:$0xff]  }
  0x13   : > { %580 = vmatpush3.bf16.msra.mxu0 %v624_v3  ;;  %608 = vmatpush3.bf16.msra.mxu1 %v624_v3 }
  0x14   : > { %581 = vmatprep.subr.bf16.mxu0 %v625_v6  ;;  %601 = vmatprep.subr.bf16.mxu1 %v625_v6 }
  0x17   : > { %582 = vmatpush3.bf16.msra.mxu0 %v625_v6  ;;  %609 = vmatpush3.bf16.msra.mxu1 %v625_v6 }
  0x18   : > { %583 = vmatprep.subr.bf16.mxu0 %v626_v7  ;;  %602 = vmatprep.subr.bf16.mxu1 %v626_v7 }
  0x1b   : > { %584 = vmatpush3.bf16.msra.mxu0 %v626_v7  ;;  %610 = vmatpush3.bf16.msra.mxu1 %v626_v7 }
  0x1c   : > { %585 = vmatprep.subr.bf16.mxu0 %v627_v8  ;;  %603 = vmatprep.subr.bf16.mxu1 %v627_v8 }
  0x1f   : > { %586 = vmatpush3.bf16.msra.mxu0 %v627_v8  ;;  %611 = vmatpush3.bf16.msra.mxu1 %v627_v8 }
  0x20   : > { %587 = vmatprep.subr.bf16.mxu0 %v628_v9  ;;  %604 = vmatprep.subr.bf16.mxu1 %v628_v9 }
  0x23   : > { %588 = vmatpush3.bf16.msra.mxu0 %v628_v9  ;;  %612 = vmatpush3.bf16.msra.mxu1 %v628_v9 }
  0x26   : > { %590 = vmatmul.mubr.bf16.vlgmr.msra.gmra.mrb[0].mxu0 %v631_v10  ;;  %594 = vmatmul.mubr.bf16.vlgmr.msra.gmra.mrb[0].mxu1 %v632_v11 }
  0xf9   : > { %v591_v13 = vpop.f32.mrb[0].mxu0  ;;  %v595_v15 = vpop.f32.mrb[0].mxu1 }
  0xfa   : > { %v372_v16 = vmul.f32 %v591_v13, %v518_v12  ;;  %v376_v17 = vmul.f32 %v595_v15, %v518_v12  ;;  %v332_v18 = vpop.f32.mrb[1].mxu0  ;;  %v348_v19 = vpop.f32.mrb[1].mxu1 }
  0xfb   : > { %v370_v20 = vmul.f32 %v518_v12, %v332_v18  ;;  %v374_v21 = vmul.f32 %v518_v12, %v348_v19  ;;  %v592_v22 = vpop.f32.mrb[2].mxu0  ;;  %v596_v23 = vpop.f32.mrb[2].mxu1 }
  0xfc   : > { %v387_v24 = vadd.f32 %v519_v14, %v372_v16  ;;  %v391_v25 = vadd.f32 %v519_v14, %v376_v17  ;;  %v373_v26 = vmul.f32 %v592_v22, %v518_v12  ;;  %v377_v27 = vmul.f32 %v596_v23, %v518_v12  ;;  %v335_v28 = vpop.f32.mrb[3].mxu0  ;;  %v351_v29 = vpop.f32.mrb[3].mxu1 }
  0xfd   : > { %v385_v30 = vadd.f32 %v519_v14, %v370_v20  ;;  %v389_v31 = vadd.f32 %v519_v14, %v374_v21  ;;  %v371_v32 = vmul.f32 %v518_v12, %v335_v28  ;;  %v375_v33 = vmul.f32 %v518_v12, %v351_v29 }
  0xfe   : > { %v388_v34 = vadd.f32 %v519_v14, %v373_v26  ;;  %v392_v35 = vadd.f32 %v519_v14, %v377_v27  ;;  %v395_v38 = vmax.f32 %v387_v24, 0.0  ;;  %v399_v39 = vmax.f32 %v391_v25, 0.0 }
  0xff   : > { %v386_v36 = vadd.f32 %v519_v14, %v371_v32  ;;  %v390_v37 = vadd.f32 %v519_v14, %v375_v33  ;;  %v393_v42 = vmax.f32 %v385_v30, 0.0  ;;  %v397_v43 = vmax.f32 %v389_v31, 0.0 }
 0x100   : > { %v396_v40 = vmax.f32 %v388_v34, 0.0  ;;  %v400_v41 = vmax.f32 %v392_v35, 0.0 }
 0x101   : > { %v394_v44 = vmax.f32 %v386_v36, 0.0  ;;  %v398_v45 = vmax.f32 %v390_v37, 0.0 }
 0x102   : > { %v546_v46 = vpack.c.bf16 %v396_v40, %v395_v38  ;;  %v556_v47 = vpack.c.bf16 %v400_v41, %v399_v39 }
 0x103   : > { %v541_v48 = vpack.c.bf16 %v394_v44, %v393_v42  ;;  %v551_v49 = vpack.c.bf16 %v398_v45, %v397_v43 }
 0x104   : > { %558 = vst [vmem:[%s199_s20 + $0x8] sm:$0xff] %v546_v46   ;;  %560 = vst [vmem:[%s199_s20 + $0x18] sm:$0xff] %v556_v47  }
 0x105   : > { %542 = vst [vmem:[%s199_s20] sm:$0xff] %v541_v48   ;;  %559 = vst [vmem:[%s199_s20 + $0x10] sm:$0xff] %v551_v49  }
 0x106 PF: > { %s14_s15 = sadd.s32 1, %s639_s15  }
 0x107   : > { %p11_p4 = scmp.ge.s32.totalorder %s14_s15, 4  }
 0x109   :  { %13 = sbr.rel (!%p11_p4) target bundleno = 1 (0x1), region = 66 }

// kernel: stem_block_forward.5
= control target key start
LH: loop header
LB: loop body
LE: loop exit
PB: predicated region body
PF: predicated region fallthrough
CT: control target
= control target key end

     0   :  { %s1333_s15 = smov 0   ;;  %s1482_s0 = inlined_call_operand.vmem [shape: bf16[2,9,9,12], index: 0, kind: input, shape index: {}]   ;;  %s1483_s1 = inlined_call_operand.vmem [shape: bf16[4,12,128], index: 1, kind: input, shape index: {}]   ;;  %s1484_s2 = inlined_call_operand.vmem [shape: f32[1,128], index: 2, kind: input, shape index: {}]   ;;  %s1485_s3 = inlined_call_operand.vmem [shape: f32[1,128], index: 3, kind: input, shape index: {}]   ;;  %s1486_s4 = inlined_call_operand.vmem [shape: bf16[2,8,8,128], index: 4, kind: output, shape index: {}]  }
   0x1 LB: > { %s1089_s16 = sadd.s32 4294967295, %s1306_s15   ;;  %p1093_p0 = scmp.ge.s32.totalorder %s1306_s15, 1  ;;  %s1306_s15 = sphi %s1333_s15, %s14_s15  }
   0x2   : > { %p162_p1 = scmp.lt.s32.totalorder %s1306_s15, 3 }
   0x4   : > { %p163_p2 = pnand %p1093_p0, %p162_p1 }
   0x5   : > { %v1288_v0 = vld [vmem:[%s1483_s1] sm:$0x3f] (!%p163_p2)   ;;  %vm247_vm0 = vcmask (!%p163_p2), 1045504   ;;  %p188_p3 = scmp.lt.s32.totalorder (!%p163_p2), %s1089_s16, 1  ;;  %v1289_v1 = vld [vmem:[%s1483_s1 + $0x10] sm:$0x3f] (!%p163_p2)  }
   0x6   : > { %166 = sbr.rel (%p163_p2) target bundleno = 291 (0x123), region = 36  ;;  %1275 = vmatprep.subr.msk.bf16.mxu1 (!%p163_p2), %vm247_vm0, %v1288_v0  ;;  %v249_v2 = vsel (!%p163_p2), %vm247_vm0, %v1288_v0, 0  ;;  %v1291_v3 = vld [vmem:[%s1483_s1 + $0x8] sm:$0x3f] (!%p163_p2)   ;;  %1277 = vmatprep.subr.msk.bf16.mxu0 (!%p163_p2), %vm247_vm0, %v1289_v1  ;;  %v629_v4 = vsel (!%p163_p2), %vm247_vm0, %v1289_v1, 0  ;;  %vm234_vm1 = vcmask (!%p163_p2), 97280  }
   0x7   : > { %1212 = vmatpush3.bf16.msra.mxu1 (!%p163_p2), %v249_v2  ;;  %1232 = vmatpush3.bf16.msra.mxu0 (!%p163_p2), %v629_v4  ;;  %v1293_v5 = vld [vmem:[%s1483_s1 + $0x18] sm:$0x3f] (!%p163_p2)   ;;  %v488_v6 = vsel (!%p163_p2), %vm247_vm0, %v1291_v3, 0  ;;  %vm340_vm2 = vsmask.f32 (!%p163_p2), 3328 }
   0x8   : > { %1276 = vmatprep.subr.msk.bf16.mxu1 (!%p163_p2), %vm247_vm0, %v1291_v3  ;;  %1278 = vmatprep.subr.msk.bf16.mxu0 (!%p163_p2), %vm247_vm0, %v1293_v5  ;;  %v881_v7 = vsel (!%p163_p2), %vm247_vm0, %v1293_v5, 0  ;;  %vm341_vm3 = vsmask.f32 (!%p163_p2), 7440  ;;  %v1164_v43 = vld [vmem:[%s1485_s3] ss:$0 sm:$0xff] (!%p163_p2) }
   0x9   : > { %vm1396_vm4 = vmor (!%p163_p2), %vm340_vm2, %vm341_vm3 }
   0xd   : > { %s1490_s16 = smov (!%p188_p3, %s1089_s16), 1 }
   0xe   : > { %s1279_s23 = smul.u32 72, %s1490_s16  ;;  %s1167_s7 = sshll.u32 %s1490_s16, 5 }
   0xf   : > { %s1473_s10 = scalar_lea.vmem %s1486_s4, %s1167_s7 }
  0x10   : > { %s1364_s28 = scalar_lea.vmem %s1482_s0, %s1279_s23 }
  0x11   : > { %v1290_v8 = vld [vmem:[%s1364_s28] ss:$8 sps:$4 sm:$0xff]   ;;  %v1294_v10 = vld [vmem:[%s1364_s28 + $0x10] ss:$8 sps:$4 sm:$0xff]   ;;  %v325_v17 = vld [vmem:[%s1364_s28 + $0x4] sm:$0x1] }
  0x12   : > { %v1292_v9 = vld [vmem:[%s1364_s28 + $0x8] ss:$8 sps:$4 sm:$0xff]   ;;  %1213 = vmatprep.mubr.msk.bf16.mxu1 %vm234_vm1, %v1290_v8  ;;  %v1295_v11 = vld [vmem:[%s1364_s28 + $0x18] ss:$8 sps:$4 sm:$0xff]   ;;  %v327_v19 = vld [vmem:[%s1364_s28 + $0xc] sm:$0x1] }
  0x13   : > { %1233 = vmatprep.mubr.msk.bf16.mxu0 %vm234_vm1, %v1292_v9  ;;  %1214 = vmatmul.mubr.msk.bf16.vlgmr.msra.gmra.mrb[0].mxu1 %vm234_vm1, %v1294_v10  ;;  %v1296_v12 = vld [vmem:[%s1364_s28 + $0x20] ss:$8 sps:$4 sm:$0xff]   ;;  %v1298_v14 = vld [vmem:[%s1364_s28 + $0x30] ss:$8 sps:$4 sm:$0xff]   ;;  %v353_v22 = vshll.u32 %v325_v17, 16  ;;  %v367_v25 = vshll.u32 %v327_v19, 16 }
  0x14   : > { %1222 = vmatpush3.bf16.msra.mxu1 %v488_v6  ;;  %1234 = vmatmul.mubr.msk.bf16.vlgmr.msra.gmra.mrb[0].mxu0 %vm234_vm1, %v1295_v11  ;;  %v1297_v13 = vld [vmem:[%s1364_s28 + $0x28] ss:$8 sps:$4 sm:$0xff]   ;;  %v1299_v15 = vld [vmem:[%s1364_s28 + $0x38] ss:$8 sps:$4 sm:$0xff]   ;;  %v1137_v27 = vld [vmem:[%s1364_s28 + $0xc] sm:$0x1] }
  0x15   : > { %1242 = vmatpush3.bf16.msra.mxu0 %v881_v7  ;;  %1217 = vmatprep.mubr.msk.bf16.mxu1 %vm234_vm1, %v1296_v12  ;;  %v324_v16 = vld [vmem:[%s1364_s28] sm:$0xf]  ;;  %v326_v18 = vld [vmem:[%s1364_s28 + $0x8] sm:$0xf]  ;;  %v355_v30 = vrot.slane %v353_v22, 5  ;;  %v369_v34 = vrot.slane %v367_v25, 5 }
  0x16   : > { %1237 = vmatprep.mubr.msk.bf16.mxu0 %vm234_vm1, %v1297_v13  ;;  %v344_v20 = vshrl.u32 %v324_v16, 16  ;;  %v347_v21 = vshll.u32 %v324_v16, 16  ;;  %v358_v23 = vshrl.u32 %v326_v18, 16  ;;  %v361_v24 = vshll.u32 %v326_v18, 16  ;;  %v1136_v26 = vld [vmem:[%s1364_s28 + $0x8] sm:$0xf] }
  0x17   : > { %v1138_v32 = vld [vmem:[%s1364_s28 + $0x10] sm:$0xf]  ;;  %v1139_v35 = vld [vmem:[%s1364_s28 + $0x14] sm:$0x1]  ;;  %v737_v36 = vshrl.u32 %v1136_v26, 16  ;;  %v740_v37 = vshll.u32 %v1136_v26, 16 }
  0x18   : > { %v346_v28 = vrot.slane %v344_v20, 4  ;;  %v349_v29 = vrot.slane %v347_v21, 5  ;;  %v360_v31 = vrot.slane %v358_v23, 4  ;;  %v363_v33 = vrot.slane %v361_v24, 5  ;;  %v328_v42 = vld [vmem:[%s1364_s28 + $0x10] sm:$0xf] }
  0x19   : > { %v746_v39 = vshll.u32 %v1137_v27, 16  ;;  %v751_v40 = vshrl.u32 %v1138_v32, 16  ;;  %v754_v41 = vshll.u32 %v1138_v32, 16  ;;  %v739_v45 = vrot.slane %v737_v36, 4  ;;  %v329_v48 = vld [vmem:[%s1364_s28 + $0x14] sm:$0x1] }
  0x1a   : > { %v350_v38 = vor.u32 %v349_v29, %v346_v28  ;;  %v364_v44 = vor.u32 %v363_v33, %v360_v31  ;;  %v742_v46 = vrot.slane %v740_v37, 5  ;;  %v760_v47 = vshll.u32 %v1139_v35, 16  ;;  %v330_v53 = vld [vmem:[%s1364_s28 + $0x18] sm:$0xf]  ;;  %v331_v60 = vld [vmem:[%s1364_s28 + $0x1c] sm:$0x1] }
  0x1b   : > { %1218 = vmatmul.mubr.msk.bf16.gmra.mrb[4].mxu1 %vm234_vm1, %v1298_v14  ;;  %v748_v50 = vrot.slane %v746_v39, 5  ;;  %v753_v51 = vrot.slane %v751_v40, 4  ;;  %v756_v52 = vrot.slane %v754_v41, 5  ;;  %v372_v57 = vshrl.u32 %v328_v42, 16  ;;  %v1140_v3 = vld [vmem:[%s1364_s28 + $0x18] sm:$0xf] }
  0x1c   : > { %1238 = vmatmul.mubr.msk.bf16.gmra.mrb[4].mxu0 %vm234_vm1, %v1299_v15  ;;  %v351_v49 = vrot.slane %v350_v38, 4  ;;  %v365_v54 = vrot.slane %v364_v44, 4  ;;  %v743_v55 = vor.u32 %v742_v46, %v739_v45  ;;  %v762_v56 = vrot.slane %v760_v47, 5  ;;  %v1141_v8 = vld [vmem:[%s1364_s28 + $0x1c] sm:$0x1] }
  0x1d   : > { %v757_v59 = vor.u32 %v756_v52, %v753_v51  ;;  %v375_v61 = vshll.u32 %v328_v42, 16  ;;  %v381_v62 = vshll.u32 %v329_v48, 16  ;;  %v374_v1 = vrot.slane %v372_v57, 4  ;;  %v1142_v13 = vld [vmem:[%s1364_s28 + $0x20] sm:$0xf] }
  0x1e   : > { %v356_v58 = vsel %vm1396_vm4, %v351_v49, %v355_v30  ;;  %v370_v63 = vsel %vm1396_vm4, %v365_v54, %v369_v34  ;;  %v744_v0 = vrot.slane %v743_v55, 4  ;;  %v386_v2 = vshrl.u32 %v330_v53, 16  ;;  %v1143_v16 = vld [vmem:[%s1364_s28 + $0x24] sm:$0x1]  ;;  %v332_v23 = vld [vmem:[%s1364_s28 + $0x20] sm:$0xf] }
  0x1f   : > { %v1108_v4 = vcombine.low %v356_v58, %v370_v63  ;;  %v758_v5 = vrot.slane %v757_v59, 4  ;;  %v377_v6 = vrot.slane %v375_v61, 5  ;;  %v383_v7 = vrot.slane %v381_v62, 5  ;;  %v333_v28 = vld [vmem:[%s1364_s28 + $0x24] sm:$0x1] }
  0x20   : > { %v749_v9 = vsel %vm1396_vm4, %v744_v0, %v748_v50  ;;  %v388_v10 = vrot.slane %v386_v2, 4  ;;  %v389_v11 = vshll.u32 %v330_v53, 16  ;;  %v395_v12 = vshll.u32 %v331_v60, 16  ;;  %v334_v33 = vld [vmem:[%s1364_s28 + $0x28] sm:$0xf] }
  0x21   : > { %1223 = vmatprep.mubr.msk.bf16.mxu1 %vm234_vm1, %v1108_v4  ;;  %v763_v14 = vsel %vm1396_vm4, %v758_v5, %v762_v56  ;;  %v378_v15 = vor.u32 %v377_v6, %v374_v1  ;;  %v765_v17 = vshrl.u32 %v1140_v3, 16  ;;  %v768_v18 = vshll.u32 %v1140_v3, 16  ;;  %v335_v41 = vld [vmem:[%s1364_s28 + $0x2c] sm:$0x1]  ;;  %v1144_v48 = vld [vmem:[%s1364_s28 + $0x28] sm:$0xf] }
  0x22   : > { %v1154_v19 = vcombine.low %v749_v9, %v763_v14  ;;  %v391_v20 = vrot.slane %v389_v11, 5  ;;  %v397_v21 = vrot.slane %v395_v12, 5  ;;  %v774_v22 = vshll.u32 %v1141_v8, 16  ;;  %v1145_v53 = vld [vmem:[%s1364_s28 + $0x2c] sm:$0x1] }
  0x23   : > { %v379_v24 = vrot.slane %v378_v15, 4  ;;  %v767_v25 = vrot.slane %v765_v17, 4  ;;  %v770_v26 = vrot.slane %v768_v18, 5  ;;  %v779_v27 = vshrl.u32 %v1142_v13, 16  ;;  %v1146_v54 = vld [vmem:[%s1364_s28 + $0x30] sm:$0xf] }
  0x24   : > { %1243 = vmatprep.mubr.msk.bf16.mxu0 %vm234_vm1, %v1154_v19  ;;  %v392_v29 = vor.u32 %v391_v20, %v388_v10  ;;  %v776_v30 = vrot.slane %v774_v22, 5  ;;  %v782_v31 = vshll.u32 %v1142_v13, 16  ;;  %v788_v32 = vshll.u32 %v1143_v16, 16  ;;  %v1147_v63 = vld [vmem:[%s1364_s28 + $0x34] sm:$0x1] }
  0x25   : > { %v384_v34 = vsel %vm1396_vm4, %v379_v24, %v383_v7  ;;  %v771_v35 = vor.u32 %v770_v26, %v767_v25  ;;  %v781_v36 = vrot.slane %v779_v27, 4  ;;  %v400_v37 = vshrl.u32 %v332_v23, 16  ;;  %v336_v8 = vld [vmem:[%s1364_s28 + $0x30] sm:$0xf]  ;;  %v337_v9 = vld [vmem:[%s1364_s28 + $0x34] sm:$0x1] }
  0x26   : > { %v393_v38 = vrot.slane %v392_v29, 4  ;;  %v784_v39 = vrot.slane %v782_v31, 5  ;;  %v790_v40 = vrot.slane %v788_v32, 5  ;;  %v403_v42 = vshll.u32 %v332_v23, 16  ;;  %v338_v14 = vld [vmem:[%s1364_s28 + $0x38] sm:$0xf] }
  0x27   : > { %v772_v44 = vrot.slane %v771_v35, 4  ;;  %v402_v45 = vrot.slane %v400_v37, 4  ;;  %v409_v46 = vshll.u32 %v333_v28, 16  ;;  %v414_v47 = vshrl.u32 %v334_v33, 16  ;;  %v1148_v28 = vld [vmem:[%s1364_s28 + $0x38] sm:$0xf] }
  0x28   : > { %v398_v49 = vsel %vm1396_vm4, %v393_v38, %v397_v21  ;;  %v785_v50 = vor.u32 %v784_v39, %v781_v36  ;;  %v405_v51 = vrot.slane %v403_v42, 5  ;;  %v417_v52 = vshll.u32 %v334_v33, 16  ;;  %v339_v21 = vld [vmem:[%s1364_s28 + $0x3c] sm:$0x1]  ;;  %v1150_v37 = vld [vmem:[%s1364_s28 + $0x40] sm:$0xf] }
  0x29   : > { %v1109_v55 = vcombine.low %v384_v34, %v398_v49  ;;  %v777_v56 = vsel %vm1396_vm4, %v772_v44, %v776_v30  ;;  %v411_v57 = vrot.slane %v409_v46, 5  ;;  %v416_v58 = vrot.slane %v414_v47, 4  ;;  %v1149_v32 = vld [vmem:[%s1364_s28 + $0x3c] sm:$0x1] }
  0x2a   : > { %v786_v59 = vrot.slane %v785_v50, 4  ;;  %v406_v60 = vor.u32 %v405_v51, %v402_v45  ;;  %v419_v61 = vrot.slane %v417_v52, 5  ;;  %v423_v62 = vshll.u32 %v335_v41, 16 }
  0x2b   : > { %1224 = vmatmul.mubr.msk.bf16.vlgmr.msra.gmra.mrb[0].mxu1 %vm234_vm1, %v1109_v55  ;;  %v793_v0 = vshrl.u32 %v1144_v48, 16  ;;  %v796_v1 = vshll.u32 %v1144_v48, 16  ;;  %v802_v2 = vshll.u32 %v1145_v53, 16  ;;  %v807_v3 = vshrl.u32 %v1146_v54, 16  ;;  %v1151_v48 = vld [vmem:[%s1364_s28 + $0x44] sm:$0x1] }
  0x2c   : > { %v791_v4 = vsel %vm1396_vm4, %v786_v59, %v790_v40  ;;  %v407_v5 = vrot.slane %v406_v60, 4  ;;  %v420_v6 = vor.u32 %v419_v61, %v416_v58  ;;  %v425_v7 = vrot.slane %v423_v62, 5 }
  0x2d   : > { %v1155_v10 = vcombine.low %v777_v56, %v791_v4  ;;  %v795_v11 = vrot.slane %v793_v0, 4  ;;  %v798_v12 = vrot.slane %v796_v1, 5  ;;  %v804_v13 = vrot.slane %v802_v2, 5 }
  0x2e   : > { %v412_v15 = vsel %vm1396_vm4, %v407_v5, %v411_v57  ;;  %v421_v16 = vrot.slane %v420_v6, 4  ;;  %v809_v17 = vrot.slane %v807_v3, 4  ;;  %v810_v18 = vshll.u32 %v1146_v54, 16 }
  0x2f   : > { %1244 = vmatmul.mubr.msk.bf16.vlgmr.msra.gmra.mrb[0].mxu0 %vm234_vm1, %v1155_v10  ;;  %v799_v19 = vor.u32 %v798_v12, %v795_v11  ;;  %v816_v20 = vshll.u32 %v1147_v63, 16  ;;  %v428_v22 = vshrl.u32 %v336_v8, 16  ;;  %v431_v23 = vshll.u32 %v336_v8, 16 }
  0x30   : > { %v426_v24 = vsel %vm1396_vm4, %v421_v16, %v425_v7  ;;  %v812_v25 = vrot.slane %v810_v18, 5  ;;  %v437_v26 = vshll.u32 %v337_v9, 16  ;;  %v442_v27 = vshrl.u32 %v338_v14, 16  ;;  %v1163_v16 = vld [vmem:[%s1484_s2] ss:$0 sm:$0xff] }
  0x31   : > { %v1110_v29 = vcombine.low %v412_v15, %v426_v24  ;;  %v800_v30 = vrot.slane %v799_v19, 4  ;;  %v430_v31 = vrot.slane %v428_v22, 4  ;;  %v818_v34 = vrot.slane %v816_v20, 5 }
  0x32   : > { %v813_v33 = vor.u32 %v812_v25, %v809_v17  ;;  %v433_v35 = vrot.slane %v431_v23, 5  ;;  %v439_v36 = vrot.slane %v437_v26, 5  ;;  %v444_v38 = vrot.slane %v442_v27, 4 }
  0x33   : > { %1227 = vmatprep.mubr.msk.bf16.mxu1 %vm234_vm1, %v1110_v29  ;;  %v445_v39 = vshll.u32 %v338_v14, 16  ;;  %v451_v40 = vshll.u32 %v339_v21, 16  ;;  %v821_v41 = vshrl.u32 %v1148_v28, 16  ;;  %v805_v42 = vsel %vm1396_vm4, %v800_v30, %v804_v13 }
  0x34   : > { %v814_v44 = vrot.slane %v813_v33, 4  ;;  %v434_v45 = vor.u32 %v433_v35, %v430_v31  ;;  %v824_v46 = vshll.u32 %v1148_v28, 16  ;;  %v830_v50 = vshll.u32 %v1149_v32, 16 }
  0x35   : > { %v447_v47 = vrot.slane %v445_v39, 5  ;;  %v823_v49 = vrot.slane %v821_v41, 4  ;;  %v835_v51 = vshrl.u32 %v1150_v37, 16  ;;  %v453_v54 = vrot.slane %v451_v40, 5 }
  0x36   : > { %v819_v52 = vsel %vm1396_vm4, %v814_v44, %v818_v34  ;;  %v435_v53 = vrot.slane %v434_v45, 4  ;;  %v826_v55 = vrot.slane %v824_v46, 5  ;;  %v838_v59 = vshll.u32 %v1150_v37, 16 }
  0x37   : > { %v1156_v56 = vcombine.low %v805_v42, %v819_v52  ;;  %v448_v57 = vor.u32 %v447_v47, %v444_v38  ;;  %v837_v58 = vrot.slane %v835_v51, 4  ;;  %v844_v61 = vshll.u32 %v1151_v48, 16 }
  0x38   : > { %v827_v60 = vor.u32 %v826_v55, %v823_v49  ;;  %v440_v62 = vsel %vm1396_vm4, %v435_v53, %v439_v36  ;;  %v832_v0 = vrot.slane %v830_v50, 5  ;;  %v840_v1 = vrot.slane %v838_v59, 5 }
  0x39   : > { %1247 = vmatprep.mubr.msk.bf16.mxu0 %vm234_vm1, %v1156_v56  ;;  %v449_v63 = vrot.slane %v448_v57, 4  ;;  %v846_v5 = vrot.slane %v844_v61, 5 }
  0x3a   : > { %v828_v2 = vrot.slane %v827_v60, 4  ;;  %v841_v4 = vor.u32 %v840_v1, %v837_v58 }
  0x3b   : > { %v454_v3 = vsel %vm1396_vm4, %v449_v63, %v453_v54 }
  0x3c   : > { %v1111_v6 = vcombine.low %v440_v62, %v454_v3  ;;  %v833_v7 = vsel %vm1396_vm4, %v828_v2, %v832_v0  ;;  %v842_v8 = vrot.slane %v841_v4, 4 }
  0x3e   : > { %1228 = vmatmul.mubr.msk.bf16.gmra.mrb[4].mxu1 %vm234_vm1, %v1111_v6  ;;  %v847_v9 = vsel %vm1396_vm4, %v842_v8, %v846_v5 }
  0x3f   : > { %v1157_v10 = vcombine.low %v833_v7, %v847_v9 }
  0x41   : > { %1248 = vmatmul.mubr.msk.bf16.gmra.mrb[4].mxu0 %vm234_vm1, %v1157_v10 }
  0xfe   : > { %v1225_v11 = vpop.f32.mrb[0].mxu1 }
  0xff   : > { %v524_v12 = vpop.f32.mrb[1].mxu1 }
 0x100   : > { %v1226_v13 = vpop.f32.mrb[2].mxu1 }
 0x101   : > { %v527_v14 = vpop.f32.mrb[3].mxu1 }
 0x102   : > { %v1245_v15 = vpop.f32.mrb[0].mxu0 }
 0x103   : > { %v1251_v17 = vadd.f32 %v1245_v15, %v1225_v11  ;;  %v917_v18 = vpop.f32.mrb[1].mxu0 }
 0x104   : > { %v1252_v19 = vadd.f32 %v917_v18, %v524_v12  ;;  %v1246_v20 = vpop.f32.mrb[2].mxu0 }
 0x105   : > { %v989_v21 = vmul.f32 %v1251_v17, %v1163_v16  ;;  %v1253_v22 = vadd.f32 %v1246_v20, %v1226_v13  ;;  %v920_v23 = vpop.f32.mrb[3].mxu0 }
 0x106   : > { %v987_v24 = vmul.f32 %v1252_v19, %v1163_v16  ;;  %v1254_v25 = vadd.f32 %v920_v23, %v527_v14 }
 0x107   : > { %v1004_v26 = vadd.f32 %v1164_v43, %v989_v21  ;;  %v990_v27 = vmul.f32 %v1253_v22, %v1163_v16 }
 0x108   : > { %v1002_v28 = vadd.f32 %v1164_v43, %v987_v24  ;;  %v988_v29 = vmul.f32 %v1254_v25, %v1163_v16 }
 0x109   : > { %v1005_v30 = vadd.f32 %v1164_v43, %v990_v27  ;;  %v1012_v32 = vmax.f32 %v1004_v26, 0.0 }
 0x10a   : > { %v1003_v31 = vadd.f32 %v1164_v43, %v988_v29  ;;  %v1010_v34 = vmax.f32 %v1002_v28, 0.0 }
 0x10b   : > { %v1013_v33 = vmax.f32 %v1005_v30, 0.0 }
 0x10c   : > { %v1011_v35 = vmax.f32 %v1003_v31, 0.0 }
 0x10d   : > { %v1176_v36 = vpack.c.bf16 %v1013_v33, %v1012_v32 }
 0x10e   : > { %v1171_v37 = vpack.c.bf16 %v1011_v35, %v1010_v34 }
 0x10f   : > { %1188 = vst [vmem:[%s1473_s10 + $0x8] sm:$0xff] %v1176_v36  }
 0x110   : > { %1172 = vst [vmem:[%s1473_s10] sm:$0xff] %v1171_v37  }
 0x111   : > { %v1229_v38 = vpop.f32.mrb[4].mxu1 }
 0x112   : > { %v540_v39 = vpop.f32.mrb[5].mxu1 }
 0x113   : > { %v1230_v40 = vpop.f32.mrb[6].mxu1 }
 0x114   : > { %v543_v41 = vpop.f32.mrb[7].mxu1  ;;  %v1249_v42 = vpop.f32.mrb[4].mxu0 }
 0x115   : > { %v1255_v44 = vadd.f32 %v1249_v42, %v1229_v38  ;;  %v933_v45 = vpop.f32.mrb[5].mxu0 }
 0x116   : > { %v1256_v46 = vadd.f32 %v933_v45, %v540_v39  ;;  %v1250_v47 = vpop.f32.mrb[6].mxu0 }
 0x117   : > { %v993_v48 = vmul.f32 %v1255_v44, %v1163_v16  ;;  %v1257_v49 = vadd.f32 %v1250_v47, %v1230_v40  ;;  %v936_v50 = vpop.f32.mrb[7].mxu0 }
 0x118   : > { %v991_v51 = vmul.f32 %v1256_v46, %v1163_v16  ;;  %v1258_v52 = vadd.f32 %v936_v50, %v543_v41 }
 0x119   : > { %v1008_v53 = vadd.f32 %v1164_v43, %v993_v48  ;;  %v994_v54 = vmul.f32 %v1257_v49, %v1163_v16 }
 0x11a   : > { %v1006_v55 = vadd.f32 %v1164_v43, %v991_v51  ;;  %v992_v56 = vmul.f32 %v1258_v52, %v1163_v16 }
 0x11b   : > { %v1009_v57 = vadd.f32 %v1164_v43, %v994_v54  ;;  %v1016_v59 = vmax.f32 %v1008_v53, 0.0 }
 0x11c   : > { %v1007_v58 = vadd.f32 %v1164_v43, %v992_v56  ;;  %v1014_v61 = vmax.f32 %v1006_v55, 0.0 }
 0x11d   : > { %v1017_v60 = vmax.f32 %v1009_v57, 0.0 }
 0x11e   : > { %v1015_v62 = vmax.f32 %v1007_v58, 0.0 }
 0x11f   : > { %v1186_v63 = vpack.c.bf16 %v1017_v60, %v1016_v59 }
 0x120   : > { %v1181_v0 = vpack.c.bf16 %v1015_v62, %v1014_v61 }
 0x121   : > { %1190 = vst [vmem:[%s1473_s10 + $0x18] sm:$0xff] %v1186_v63  }
 0x122   : > { %1189 = vst [vmem:[%s1473_s10 + $0x10] sm:$0xff] %v1181_v0  }
 0x123 PF: > { %s14_s15 = sadd.s32 1, %s1306_s15  }
 0x124   : > { %p11_p4 = scmp.ge.s32.totalorder %s14_s15, 4  }
 0x126   :  { %13 = sbr.rel (!%p11_p4) target bundleno = 1 (0x1), region = 70 }

// kernel: stem_block_forward.8
= control target key start
LH: loop header
LB: loop body
LE: loop exit
PB: predicated region body
PF: predicated region fallthrough
CT: control target
= control target key end

     0   :  { %s259_s6 = smov 0   ;;  %s276_s0 = inlined_call_operand.vmem [shape: bf16[2,8,4,256], index: 0, kind: input, shape index: {}]   ;;  %s277_s1 = inlined_call_operand.vmem [shape: bf16[2,4,4,128], index: 1, kind: output, shape index: {}]  }
   0x1 LB: > { %s220_s7 = sadd.s32 4294967295, %s247_s6   ;;  %p224_p0 = scmp.ge.s32.totalorder %s247_s6, 1  ;;  %s247_s6 = sphi %s259_s6, %s11_s6  }
   0x2   : > { %p87_p1 = scmp.lt.s32.totalorder %s247_s6, 3 }
   0x4   : > { %p88_p2 = pnand %p224_p0, %p87_p1 }
   0x5   : > { %p107_p3 = scmp.lt.s32.totalorder (!%p88_p2), %s220_s7, 1 }
   0x6   : > { %91 = sbr.rel (%p88_p2) target bundleno = 27 (0x1b), region = 24 }
   0xd   : > { %s279_s7 = smov (!%p107_p3, %s220_s7), 1 }
   0xe   : > { %s231_s8 = sshll.u32 %s279_s7, 5  ;;  %s232_s12 = sshll.u32 %s279_s7, 3 }
   0xf   : > { %s111_s11 = scalar_lea.vmem %s276_s0, %s231_s8  ;;  %s116_s15 = scalar_lea.vmem %s277_s1, %s232_s12 }
  0x10   : > { %v117_v0 = vld [vmem:[%s111_s11] sm:$0xf]  ;;  %v118_v1 = vld [vmem:[%s111_s11 + $0x4] sm:$0xf]  ;;  %v119_v2 = vld [vmem:[%s111_s11 + $0x8] sm:$0xf] }
  0x11   : > { %v133_v3 = vrot.slane %v117_v0, 2  ;;  %v134_v4 = vrot.slane %v118_v1, 2  ;;  %v120_v5 = vld [vmem:[%s111_s11 + $0xc] sm:$0xf]  ;;  %v135_v6 = vrot.slane %v119_v2, 2 }
  0x12   : > { %v136_v7 = vrot.slane %v120_v5, 2  ;;  %v121_v8 = vld [vmem:[%s111_s11 + $0x10] sm:$0xf]  ;;  %v122_v9 = vld [vmem:[%s111_s11 + $0x14] sm:$0xf] }
  0x13   : > { %v149_v10 = vmax.bf16 %v133_v3, %v117_v0  ;;  %v150_v11 = vmax.bf16 %v134_v4, %v118_v1  ;;  %v151_v12 = vmax.bf16 %v135_v6, %v119_v2  ;;  %v137_v13 = vrot.slane %v121_v8, 2  ;;  %v123_v14 = vld [vmem:[%s111_s11 + $0x18] sm:$0xf]  ;;  %v124_v15 = vld [vmem:[%s111_s11 + $0x1c] sm:$0xf] }
  0x14   : > { %v152_v16 = vmax.bf16 %v136_v7, %v120_v5  ;;  %v138_v17 = vrot.slane %v122_v9, 2  ;;  %v139_v18 = vrot.slane %v123_v14, 2  ;;  %v140_v19 = vrot.slane %v124_v15, 2 }
  0x15   : > { %v157_v20 = vmax.bf16 %v150_v11, %v149_v10  ;;  %v153_v21 = vmax.bf16 %v137_v13, %v121_v8 }
  0x16   : > { %v158_v22 = vmax.bf16 %v152_v16, %v151_v12  ;;  %v154_v23 = vmax.bf16 %v138_v17, %v122_v9  ;;  %v155_v24 = vmax.bf16 %v139_v18, %v123_v14  ;;  %v156_v25 = vmax.bf16 %v140_v19, %v124_v15 }
  0x17   : > { %161 = vst [vmem:[%s116_s15] sm:$0x3] %v157_v20 }
  0x18   : > { %162 = vst [vmem:[%s116_s15 + $0x2] sm:$0x3] %v158_v22  ;;  %v159_v26 = vmax.bf16 %v154_v23, %v153_v21  ;;  %v160_v27 = vmax.bf16 %v156_v25, %v155_v24 }
  0x1a   : > { %163 = vst [vmem:[%s116_s15 + $0x4] sm:$0x3] %v159_v26  ;;  %164 = vst [vmem:[%s116_s15 + $0x6] sm:$0x3] %v160_v27 }
  0x1b PF: > { %s11_s6 = sadd.s32 1, %s247_s6  }
  0x1c   : > { %p8_p4 = scmp.ge.s32.totalorder %s11_s6, 4  }
  0x1e   :  { %10 = sbr.rel (!%p8_p4) target bundleno = 1 (0x1), region = 54 }

// kernel: stem_block_forward.9
= control target key start
LH: loop header
LB: loop body
LE: loop exit
PB: predicated region body
PF: predicated region fallthrough
CT: control target
= control target key end

     0   :  { %s760_s21 = smov 0   ;;  %s838_s0 = inlined_call_operand.vmem [shape: bf16[32,128], index: 0, kind: input, shape index: {}]   ;;  %s839_s1 = inlined_call_operand.vmem [shape: bf16[32,128], index: 1, kind: input, shape index: {}]   ;;  %s840_s2 = inlined_call_operand.vmem [shape: bf16[128,128], index: 2, kind: input, shape index: {}]   ;;  %s841_s3 = inlined_call_operand.vmem [shape: bf16[128,128], index: 3, kind: input, shape index: {}]   ;;  %s842_s4 = inlined_call_operand.vmem [shape: f32[1,128], index: 4, kind: input, shape index: {}]   ;;  %s843_s5 = inlined_call_operand.vmem [shape: f32[1,128], index: 5, kind: input, shape index: {}]   ;;  %s844_s6 = inlined_call_operand.vmem [shape: f32[32,128], index: 6, kind: output, shape index: {}]  }
   0x1 LB: > { %s594_s22 = sadd.s32 4294967295, %s721_s21   ;;  %p598_p0 = scmp.ge.s32.totalorder %s721_s21, 1  ;;  %s721_s21 = sphi %s760_s21, %s16_s21  }
   0x2   : > { %p224_p1 = scmp.lt.s32.totalorder %s721_s21, 3 }
   0x4   : > { %p225_p2 = pnand %p598_p0, %p224_p1 }
   0x5   : > { %v697_v0 = vld [vmem:[%s841_s3] sm:$0xff] (!%p225_p2)   ;;  %v723_v1 = vmov (!%p225_p2), 0.0   ;;  %v699_v3 = vld [vmem:[%s841_s3 + $0x8] sm:$0xff] (!%p225_p2)   ;;  %vm724_vm0 = vmmov (!%p225_p2), 0   ;;  %s599_s29 = sshll.u32 (!%p225_p2), %s594_s22, 1  ;;  %v701_v5 = vld [vmem:[%s841_s3 + $0x10] sm:$0xff] (!%p225_p2)  }
   0x6   : > { %228 = sbr.rel (%p225_p2) target bundleno = 262 (0x106), region = 44  ;;  %645 = vmatprep.subr.bf16.mxu1 (!%p225_p2), %v723_v1  ;;  %665 = vmatprep.subr.bf16.mxu0 (!%p225_p2), %v723_v1  ;;  %v698_v2 = vld [vmem:[%s840_s2] sm:$0xff] (!%p225_p2)   ;;  %v700_v4 = vld [vmem:[%s840_s2 + $0x8] sm:$0xff] (!%p225_p2)   ;;  %p260_p3 = scmp.lt.s32.totalorder (!%p225_p2), %s599_s29, 3  ;;  %v702_v6 = vld [vmem:[%s840_s2 + $0x10] sm:$0xff] (!%p225_p2)  }
   0x7   : > { %646 = vmatpush3.bf16.msra.mxu1 (!%p225_p2), %v697_v0  ;;  %661 = vmatprep.mubr.msk.bf16.mxu1 (!%p225_p2), %vm724_vm0, %v723_v1  ;;  %v703_v7 = vld [vmem:[%s841_s3 + $0x18] sm:$0xff] (!%p225_p2)   ;;  %v705_v9 = vld [vmem:[%s841_s3 + $0x20] sm:$0xff] (!%p225_p2)   ;;  %v707_v11 = vld [vmem:[%s841_s3 + $0x28] sm:$0xff] (!%p225_p2)  }
   0x8   : > { %666 = vmatpush3.bf16.msra.mxu0 (!%p225_p2), %v698_v2  ;;  %647 = vmatprep.subr.bf16.mxu1 (!%p225_p2), %v723_v1  ;;  %v704_v8 = vld [vmem:[%s840_s2 + $0x18] sm:$0xff] (!%p225_p2)   ;;  %v706_v10 = vld [vmem:[%s840_s2 + $0x20] sm:$0xff] (!%p225_p2)   ;;  %v708_v12 = vld [vmem:[%s840_s2 + $0x28] sm:$0xff] (!%p225_p2)  }
   0x9   : > { %667 = vmatprep.subr.bf16.mxu0 (!%p225_p2), %v723_v1  ;;  %681 = vmatprep.mubr.msk.bf16.mxu0 (!%p225_p2), %vm724_vm0, %v723_v1  ;;  %v709_v13 = vld [vmem:[%s841_s3 + $0x30] sm:$0xff] (!%p225_p2)   ;;  %v711_v15 = vld [vmem:[%s841_s3 + $0x38] sm:$0xff] (!%p225_p2)   ;;  %v623_v21 = vld [vmem:[%s842_s4] ss:$0 sm:$0xff] (!%p225_p2) }
   0xa   : > { %v710_v14 = vld [vmem:[%s840_s2 + $0x30] sm:$0xff] (!%p225_p2)   ;;  %v712_v16 = vld [vmem:[%s840_s2 + $0x38] sm:$0xff] (!%p225_p2)   ;;  %v624_v26 = vld [vmem:[%s843_s5] ss:$0 sm:$0xff] (!%p225_p2) }
   0xb   : > { %648 = vmatpush3.bf16.msra.mxu1 (!%p225_p2), %v699_v3 }
   0xc   : > { %668 = vmatpush3.bf16.msra.mxu0 (!%p225_p2), %v700_v4  ;;  %649 = vmatprep.subr.bf16.mxu1 (!%p225_p2), %v723_v1 }
   0xd   : > { %669 = vmatprep.subr.bf16.mxu0 %v723_v1  ;;  %s846_s29 = smov (!%p260_p3, %s599_s29), 3 }
   0xe   : > { %s600_s16 = sshll.u32 %s846_s29, 2  ;;  %s604_s22 = sshll.u32 %s846_s29, 3 }
   0xf   : > { %650 = vmatpush3.bf16.msra.mxu1 %v701_v5  ;;  %s269_s24 = scalar_lea.vmem %s839_s1, %s600_s16  ;;  %s263_s27 = scalar_lea.vmem %s838_s0, %s600_s16 }
  0x10   : > { %670 = vmatpush3.bf16.msra.mxu0 %v702_v6  ;;  %651 = vmatprep.subr.bf16.mxu1 %v723_v1  ;;  %v713_v17 = vld [vmem:[%s269_s24] sm:$0xff]   ;;  %s275_s25 = scalar_lea.vmem %s844_s6, %s604_s22 }
  0x11   : > { %671 = vmatprep.subr.bf16.mxu0 %v723_v1  ;;  %v714_v18 = vld [vmem:[%s263_s27] sm:$0xff]  }
  0x13   : > { %652 = vmatpush3.bf16.msra.mxu1 %v703_v7 }
  0x14   : > { %672 = vmatpush3.bf16.msra.mxu0 %v704_v8  ;;  %653 = vmatprep.subr.bf16.mxu1 %v723_v1 }
  0x15   : > { %673 = vmatprep.subr.bf16.mxu0 %v723_v1 }
  0x17   : > { %654 = vmatpush3.bf16.msra.mxu1 %v705_v9 }
  0x18   : > { %674 = vmatpush3.bf16.msra.mxu0 %v706_v10  ;;  %655 = vmatprep.subr.bf16.mxu1 %v723_v1 }
  0x19   : > { %675 = vmatprep.subr.bf16.mxu0 %v723_v1 }
  0x1b   : > { %656 = vmatpush3.bf16.msra.mxu1 %v707_v11 }
  0x1c   : > { %676 = vmatpush3.bf16.msra.mxu0 %v708_v12  ;;  %657 = vmatprep.subr.bf16.mxu1 %v723_v1 }
  0x1d   : > { %677 = vmatprep.subr.bf16.mxu0 %v723_v1 }
  0x1f   : > { %658 = vmatpush3.bf16.msra.mxu1 %v709_v13 }
  0x20   : > { %678 = vmatpush3.bf16.msra.mxu0 %v710_v14  ;;  %659 = vmatprep.subr.bf16.mxu1 %v723_v1 }
  0x21   : > { %679 = vmatprep.subr.bf16.mxu0 %v723_v1 }
  0x23   : > { %660 = vmatpush3.bf16.msra.mxu1 %v711_v15 }
  0x24   : > { %680 = vmatpush3.bf16.msra.mxu0 %v712_v16 }
  0x26   : > { %662 = vmatmul.mubr.bf16.vlgmr.msra.gmra.mrb[0].mxu1 %v713_v17 }
  0x27   : > { %682 = vmatmul.mubr.bf16.vlgmr.msra.gmra.mrb[0].mxu0 %v714_v18 }
  0xf9   : > { %v402_v19 = vpop.f32.mrb[0].mxu1 }
  0xfa   : > { %v497_v20 = vpop.f32.mrb[0].mxu0  ;;  %v663_v22 = vpop.f32.mrb[1].mxu1 }
  0xfb   : > { %v498_v23 = vadd.f32 %v497_v20, %v402_v19  ;;  %v683_v24 = vpop.f32.mrb[1].mxu0  ;;  %v405_v25 = vpop.f32.mrb[2].mxu1 }
  0xfc   : > { %v500_v27 = vpop.f32.mrb[2].mxu0  ;;  %v664_v28 = vpop.f32.mrb[3].mxu1 }
  0xfd   : > { %v511_v29 = vmul.f32 %v623_v21, %v498_v23  ;;  %v501_v30 = vadd.f32 %v500_v27, %v405_v25  ;;  %v684_v31 = vpop.f32.mrb[3].mxu0 }
  0xff   : > { %v520_v32 = vadd.f32 %v624_v26, %v511_v29  ;;  %v512_v33 = vmul.f32 %v623_v21, %v501_v30 }
 0x101   : > { %v522_v34 = vmax.f32 %v520_v32, 0.0  ;;  %v521_v35 = vadd.f32 %v624_v26, %v512_v33 }
 0x103   : > { %524 = vst [vmem:[%s275_s25] sm:$0xff] %v522_v34  ;;  %v523_v36 = vmax.f32 %v521_v35, 0.0 }
 0x105   : > { %525 = vst [vmem:[%s275_s25 + $0x8] sm:$0xff] %v523_v36 }
 0x106 PF: > { %s16_s21 = sadd.s32 1, %s721_s21  }
 0x107   : > { %p13_p4 = scmp.ge.s32.totalorder %s16_s21, 4  }
 0x109   :  { %15 = sbr.rel (!%p13_p4) target bundleno = 1 (0x1), region = 77 }

// kernel: stem_block_forward.7
= control target key start
LH: loop header
LB: loop body
LE: loop exit
PB: predicated region body
PF: predicated region fallthrough
CT: control target
= control target key end

     0   :  { %s2954_s15 = smov 0   ;;  %s3510_s0 = inlined_call_operand.vmem [shape: bf16[2,5,9,512], index: 0, kind: input, shape index: {}]   ;;  %s3511_s1 = inlined_call_operand.vmem [shape: bf16[4,512,128], index: 1, kind: input, shape index: {}]   ;;  %s3512_s2 = inlined_call_operand.vmem [shape: f32[1,128], index: 2, kind: input, shape index: {}]   ;;  %s3513_s3 = inlined_call_operand.vmem [shape: f32[1,128], index: 3, kind: input, shape index: {}]   ;;  %s3514_s4 = inlined_call_operand.vmem [shape: bf16[2,4,4,128], index: 4, kind: output, shape index: {}]  }
   0x1 LB: > { %s2171_s16 = sadd.s32 4294967295, %s2927_s15   ;;  %p2175_p0 = scmp.ge.s32.totalorder %s2927_s15, 1  ;;  %s2927_s15 = sphi %s2954_s15, %s14_s15  }
   0x2   : > { %p162_p1 = scmp.lt.s32.totalorder %s2927_s15, 3 }
   0x4   : > { %p163_p2 = pnand %p2175_p0, %p162_p1 }
   0x5   : > { %v2793_v0 = vld [vmem:[%s3511_s1 + $0x40] sm:$0xff] (!%p163_p2)   ;;  %v2797_v4 = vld [vmem:[%s3511_s1 + $0x48] sm:$0xff] (!%p163_p2)   ;;  %v2801_v8 = vld [vmem:[%s3511_s1 + $0x50] sm:$0xff] (!%p163_p2)   ;;  %p188_p3 = scmp.lt.s32.totalorder (!%p163_p2), %s2171_s16, 1  ;;  %vm621_vm0 = vsmask.f32 (!%p163_p2), 3328 }
   0x6   : > { %166 = sbr.rel (%p163_p2) target bundleno = 374 (0x176), region = 36  ;;  %v2794_v1 = vld [vmem:[%s3511_s1 + $0xc0] sm:$0xff] (!%p163_p2)   ;;  %2560 = vmatprep.subr.bf16.mxu0 (!%p163_p2), %v2793_v0  ;;  %v2798_v5 = vld [vmem:[%s3511_s1 + $0xc8] sm:$0xff] (!%p163_p2)   ;;  %v2802_v9 = vld [vmem:[%s3511_s1 + $0xd0] sm:$0xff] (!%p163_p2)   ;;  %vm622_vm1 = vsmask.f32 (!%p163_p2), 7440 }
   0x7   : > { %v2795_v2 = vld [vmem:[%s3511_s1] sm:$0xff] (!%p163_p2)   ;;  %2588 = vmatprep.subr.bf16.mxu1 (!%p163_p2), %v2794_v1  ;;  %v2799_v6 = vld [vmem:[%s3511_s1 + $0x8] sm:$0xff] (!%p163_p2)   ;;  %v2803_v10 = vld [vmem:[%s3511_s1 + $0x10] sm:$0xff] (!%p163_p2)  }
   0x8   : > { %v2796_v3 = vld [vmem:[%s3511_s1 + $0x80] sm:$0xff] (!%p163_p2)   ;;  %2561 = vmatpush3.bf16.msra.mxu0 (!%p163_p2), %v2795_v2  ;;  %v2800_v7 = vld [vmem:[%s3511_s1 + $0x88] sm:$0xff] (!%p163_p2)   ;;  %v2804_v11 = vld [vmem:[%s3511_s1 + $0x90] sm:$0xff] (!%p163_p2)  }
   0x9   : > { %2589 = vmatpush3.bf16.msra.mxu1 (!%p163_p2), %v2796_v3  ;;  %2562 = vmatprep.subr.bf16.mxu0 (!%p163_p2), %v2797_v4  ;;  %v2805_v12 = vld [vmem:[%s3511_s1 + $0x58] sm:$0xff] (!%p163_p2)   ;;  %v2809_v16 = vld [vmem:[%s3511_s1 + $0x60] sm:$0xff] (!%p163_p2)   ;;  %v2813_v20 = vld [vmem:[%s3511_s1 + $0x68] sm:$0xff] (!%p163_p2)  }
   0xa   : > { %2590 = vmatprep.subr.bf16.mxu1 (!%p163_p2), %v2798_v5  ;;  %v2806_v13 = vld [vmem:[%s3511_s1 + $0xd8] sm:$0xff] (!%p163_p2)   ;;  %v2810_v17 = vld [vmem:[%s3511_s1 + $0xe0] sm:$0xff] (!%p163_p2)   ;;  %v2814_v21 = vld [vmem:[%s3511_s1 + $0xe8] sm:$0xff] (!%p163_p2)  }
   0xb   : > { %v2807_v14 = vld [vmem:[%s3511_s1 + $0x18] sm:$0xff] (!%p163_p2)   ;;  %v2811_v18 = vld [vmem:[%s3511_s1 + $0x20] sm:$0xff] (!%p163_p2)   ;;  %v2815_v22 = vld [vmem:[%s3511_s1 + $0x28] sm:$0xff] (!%p163_p2)  }
   0xc   : > { %2563 = vmatpush3.bf16.msra.mxu0 (!%p163_p2), %v2799_v6  ;;  %v2808_v15 = vld [vmem:[%s3511_s1 + $0x98] sm:$0xff] (!%p163_p2)   ;;  %v2812_v19 = vld [vmem:[%s3511_s1 + $0xa0] sm:$0xff] (!%p163_p2)   ;;  %v2816_v23 = vld [vmem:[%s3511_s1 + $0xa8] sm:$0xff] (!%p163_p2)  }
   0xd   : > { %2591 = vmatpush3.bf16.msra.mxu1 %v2800_v7  ;;  %2564 = vmatprep.subr.bf16.mxu0 %v2801_v8  ;;  %s3518_s16 = smov (!%p188_p3, %s2171_s16), 1  ;;  %v2817_v24 = vld [vmem:[%s3511_s1 + $0x70] sm:$0xff]   ;;  %v2821_v28 = vld [vmem:[%s3511_s1 + $0x78] sm:$0xff]   ;;  %v2825_v40 = vld [vmem:[%s3511_s1 + $0x140] sm:$0xff]  }
   0xe   : > { %2592 = vmatprep.subr.bf16.mxu1 %v2802_v9  ;;  %v2818_v25 = vld [vmem:[%s3511_s1 + $0xf0] sm:$0xff]   ;;  %s2784_s21 = smul.u32 160, %s3518_s16  ;;  %v2822_v29 = vld [vmem:[%s3511_s1 + $0xf8] sm:$0xff]   ;;  %v2826_v42 = vld [vmem:[%s3511_s1 + $0x1c0] sm:$0xff]   ;;  %s2559_s24 = sshll.u32 %s3518_s16, 3 }
   0xf   : > { %v2819_v26 = vld [vmem:[%s3511_s1 + $0x30] sm:$0xff]   ;;  %v2823_v30 = vld [vmem:[%s3511_s1 + $0x38] sm:$0xff]   ;;  %v2827_v44 = vld [vmem:[%s3511_s1 + $0x100] sm:$0xff]   ;;  %s197_s27 = scalar_lea.vmem %s3514_s4, %s2559_s24 }
  0x10   : > { %2565 = vmatpush3.bf16.msra.mxu0 %v2803_v10  ;;  %v2820_v27 = vld [vmem:[%s3511_s1 + $0xb0] sm:$0xff]   ;;  %s3062_s6 = scalar_lea.vmem %s3510_s0, %s2784_s21  ;;  %v2824_v31 = vld [vmem:[%s3511_s1 + $0xb8] sm:$0xff]   ;;  %v2828_v45 = vld [vmem:[%s3511_s1 + $0x180] sm:$0xff]  }
  0x11   : > { %2593 = vmatpush3.bf16.msra.mxu1 %v2804_v11  ;;  %2566 = vmatprep.subr.bf16.mxu0 %v2805_v12  ;;  %v199_v32 = vld [vmem:[%s3062_s6] sm:$0xff]  ;;  %v200_v34 = vld [vmem:[%s3062_s6 + $0x8] sm:$0xff]  ;;  %v2833_v55 = vld [vmem:[%s3511_s1 + $0x150] sm:$0xff]  }
  0x12   : > { %2594 = vmatprep.subr.bf16.mxu1 %v2806_v13  ;;  %v3072_v33 = vld [vmem:[%s3062_s6 + $0x20] sm:$0xff]  ;;  %v3078_v37 = vld [vmem:[%s3062_s6 + $0x28] sm:$0xff]  ;;  %v625_v41 = vshrl.u32 %v199_v32, 16  ;;  %v628_v43 = vshll.u32 %v199_v32, 16  ;;  %v639_v56 = vshrl.u32 %v200_v34, 16  ;;  %v2834_v57 = vld [vmem:[%s3511_s1 + $0x1d0] sm:$0xff]  }
  0x13   : > { %v2179_v35 = vcombine.low %v199_v32, %v3072_v33  ;;  %v2180_v36 = vcombine.high %v199_v32, %v3072_v33  ;;  %v2181_v38 = vcombine.low %v200_v34, %v3078_v37  ;;  %v2182_v39 = vcombine.high %v200_v34, %v3078_v37  ;;  %v2829_v47 = vld [vmem:[%s3511_s1 + $0x148] sm:$0xff]   ;;  %v2835_v59 = vld [vmem:[%s3511_s1 + $0x110] sm:$0xff]   ;;  %v2837_v63 = vld [vmem:[%s3511_s1 + $0x158] sm:$0xff]  }
  0x14   : > { %2567 = vmatpush3.bf16.msra.mxu0 %v2807_v14  ;;  %v653_v46 = vshrl.u32 %v3072_v33, 16  ;;  %v627_v48 = vrot.slane %v625_v41, 4  ;;  %v2830_v49 = vld [vmem:[%s3511_s1 + $0x1c8] sm:$0xff]   ;;  %v630_v50 = vrot.slane %v628_v43, 5  ;;  %v656_v52 = vshll.u32 %v3072_v33, 16  ;;  %v2836_v61 = vld [vmem:[%s3511_s1 + $0x190] sm:$0xff]   ;;  %vm3221_vm2 = vmor %vm621_vm0, %vm622_vm1 }
  0x15   : > { %2595 = vmatpush3.bf16.msra.mxu1 %v2808_v15  ;;  %2568 = vmatprep.subr.bf16.mxu0 %v2809_v16  ;;  %v2831_v51 = vld [vmem:[%s3511_s1 + $0x108] sm:$0xff]   ;;  %v642_v58 = vshll.u32 %v200_v34, 16  ;;  %v641_v62 = vrot.slane %v639_v56, 4  ;;  %v2838_v1 = vld [vmem:[%s3511_s1 + $0x1d8] sm:$0xff]   ;;  %v667_v2 = vshrl.u32 %v3078_v37, 16  ;;  %v670_v4 = vshll.u32 %v3078_v37, 16 }
  0x16   : > { %2596 = vmatprep.subr.bf16.mxu1 %v2810_v17  ;;  %535 = vmatprep.mubr.bf16.mxu0 %v2180_v36  ;;  %v2832_v53 = vld [vmem:[%s3511_s1 + $0x188] sm:$0xff]   ;;  %v655_v54 = vrot.slane %v653_v46, 4  ;;  %v658_v60 = vrot.slane %v656_v52, 5  ;;  %v2839_v3 = vld [vmem:[%s3511_s1 + $0x118] sm:$0xff]   ;;  %v2841_v6 = vld [vmem:[%s3511_s1 + $0x160] sm:$0xff]   ;;  %v631_v9 = vor.u32 %v630_v50, %v627_v48 }
  0x17   : > { %584 = vmatprep.mubr.bf16.mxu1 %v2182_v39  ;;  %v644_v0 = vrot.slane %v642_v58, 5  ;;  %v2840_v5 = vld [vmem:[%s3511_s1 + $0x198] sm:$0xff]   ;;  %v669_v7 = vrot.slane %v667_v2, 4  ;;  %v2842_v8 = vld [vmem:[%s3511_s1 + $0x1e0] sm:$0xff]   ;;  %v672_v12 = vrot.slane %v670_v4, 5  ;;  %v2845_v15 = vld [vmem:[%s3511_s1 + $0x168] sm:$0xff]  }
  0x18   : > { %2569 = vmatpush3.bf16.msra.mxu0 %v2811_v18  ;;  %v659_v10 = vor.u32 %v658_v60, %v655_v54  ;;  %v2843_v13 = vld [vmem:[%s3511_s1 + $0x120] sm:$0xff]   ;;  %v2846_v16 = vld [vmem:[%s3511_s1 + $0x1e8] sm:$0xff]   ;;  %v2849_v36 = vld [vmem:[%s3511_s1 + $0x170] sm:$0xff]  }
  0x19   : > { %2597 = vmatpush3.bf16.msra.mxu1 %v2812_v19  ;;  %2570 = vmatprep.subr.bf16.mxu0 %v2813_v20  ;;  %v645_v11 = vor.u32 %v644_v0, %v641_v62  ;;  %v2844_v14 = vld [vmem:[%s3511_s1 + $0x1a0] sm:$0xff]   ;;  %v3158_v19 = vrot.slane %v631_v9, 4  ;;  %v2848_v34 = vld [vmem:[%s3511_s1 + $0x1a8] sm:$0xff]   ;;  %v2850_v39 = vld [vmem:[%s3511_s1 + $0x1f0] sm:$0xff]  }
  0x1a   : > { %2598 = vmatprep.subr.bf16.mxu1 %v2814_v21  ;;  %v3153_v17 = vld [vmem:[%s3062_s6 + $0x40] sm:$0xff]  ;;  %v3160_v20 = vrot.slane %v659_v10, 4  ;;  %v2851_v41 = vld [vmem:[%s3511_s1 + $0x130] sm:$0xff]   ;;  %v2853_v46 = vld [vmem:[%s3511_s1 + $0x178] sm:$0xff]  }
  0x1b   : > { %v3156_v18 = vld [vmem:[%s3062_s6 + $0x60] sm:$0xff]  ;;  %v3162_v21 = vrot.slane %v645_v11, 4  ;;  %v2854_v48 = vld [vmem:[%s3511_s1 + $0x1f8] sm:$0xff]  }
  0x1c   : > { %2571 = vmatpush3.bf16.msra.mxu0 %v2815_v22  ;;  %v673_v22 = vor.u32 %v672_v12, %v669_v7  ;;  %v709_v32 = vshrl.u32 %v3156_v18, 16  ;;  %v712_v43 = vshll.u32 %v3156_v18, 16  ;;  %v2855_v50 = vld [vmem:[%s3511_s1 + $0x138] sm:$0xff]   ;;  %v2858_v2 = vld [vmem:[%s3511_s1 + $0x2c0] sm:$0xff]  }
  0x1d   : > { %2599 = vmatpush3.bf16.msra.mxu1 %v2816_v23  ;;  %2572 = vmatprep.subr.bf16.mxu0 %v2817_v24  ;;  %v2184_v23 = vcombine.high %v3153_v17, %v3156_v18  ;;  %v3167_v24 = vld [vmem:[%s3062_s6 + $0x48] sm:$0xff]  ;;  %v2856_v52 = vld [vmem:[%s3511_s1 + $0x1b8] sm:$0xff]   ;;  %v2860_v11 = vld [vmem:[%s3511_s1 + $0x280] sm:$0xff]  }
  0x1e   : > { %2600 = vmatprep.subr.bf16.mxu1 %v2818_v25  ;;  %v3170_v25 = vld [vmem:[%s3062_s6 + $0x68] sm:$0xff]  ;;  %v698_v58 = vshll.u32 %v3167_v24, 16 }
  0x1f   : > { %v723_v12 = vshrl.u32 %v3170_v25, 16 }
  0x20   : > { %2573 = vmatpush3.bf16.msra.mxu0 %v2819_v26  ;;  %v2183_v26 = vcombine.low %v3153_v17, %v3156_v18 }
  0x21   : > { %2601 = vmatpush3.bf16.msra.mxu1 %v2820_v27  ;;  %2574 = vmatprep.subr.bf16.mxu0 %v2821_v28  ;;  %v681_v27 = vshrl.u32 %v3153_v17, 16  ;;  %v684_v28 = vshll.u32 %v3153_v17, 16 }
  0x22   : > { %2602 = vmatprep.subr.bf16.mxu1 %v2822_v29  ;;  %v2186_v29 = vcombine.high %v3167_v24, %v3170_v25 }
  0x24   : > { %2575 = vmatpush3.bf16.msra.mxu0 %v2823_v30  ;;  %v2847_v30 = vld [vmem:[%s3511_s1 + $0x128] sm:$0xff]  }
  0x25   : > { %2603 = vmatpush3.bf16.msra.mxu1 %v2824_v31  ;;  %2616 = vmatprep.subr.bf16.mxu0 %v2825_v40  ;;  %v2185_v31 = vcombine.low %v3167_v24, %v3170_v25  ;;  %v674_v40 = vrot.slane %v673_v22, 4  ;;  %v2862_v22 = vld [vmem:[%s3511_s1 + $0x2c8] sm:$0xff]  }
  0x26   : > { %2644 = vmatprep.subr.bf16.mxu1 %v2826_v42 }
  0x27   : > { %536 = vmatmul.mubr.bf16.vlgmr.msra.gmra.mrb[0].mxu0 %v2179_v35  ;;  %v683_v35 = vrot.slane %v681_v27, 4 }
  0x28   : > { %585 = vmatmul.mubr.bf16.vlgmr.msra.gmra.mrb[0].mxu1 %v2181_v38  ;;  %2617 = vmatpush3.bf16.msra.mxu0 %v2827_v44  ;;  %v686_v38 = vrot.slane %v684_v28, 5  ;;  %v2852_v44 = vld [vmem:[%s3511_s1 + $0x1b0] sm:$0xff]   ;;  %v726_v28 = vshll.u32 %v3170_v25, 16 }
  0x29   : > { %2645 = vmatpush3.bf16.msra.mxu1 %v2828_v45  ;;  %2618 = vmatprep.subr.bf16.mxu0 %v2829_v47  ;;  %v695_v45 = vshrl.u32 %v3167_v24, 16  ;;  %v711_v47 = vrot.slane %v709_v32, 4  ;;  %v619_v32 = vld [vmem:[%s3062_s6 + $0x70] sm:$0x11] }
  0x2a   : > { %2646 = vmatprep.subr.bf16.mxu1 %v2830_v49  ;;  %543 = vmatprep.mubr.bf16.mxu0 %v2184_v23  ;;  %v687_v42 = vor.u32 %v686_v38, %v683_v35  ;;  %v620_v38 = vld [vmem:[%s3062_s6 + $0x78] sm:$0x11] }
  0x2b   : > { %592 = vmatprep.mubr.bf16.mxu1 %v2186_v29  ;;  %v697_v54 = vrot.slane %v695_v45, 4  ;;  %v2864_v29 = vld [vmem:[%s3511_s1 + $0x288] sm:$0xff]  }
  0x2c   : > { %2619 = vmatpush3.bf16.msra.mxu0 %v2831_v51  ;;  %v3207_v49 = vrot.slane %v687_v42, 4  ;;  %v714_v51 = vrot.slane %v712_v43, 5  ;;  %v732_v42 = vshll.u32 %v620_v38, 16 }
  0x2d   : > { %2647 = vmatpush3.bf16.msra.mxu1 %v2832_v53  ;;  %2620 = vmatprep.subr.bf16.mxu0 %v2833_v55  ;;  %v607_v53 = vld [vmem:[%s3062_s6 + $0x10] sm:$0x11] }
  0x2e   : > { %2648 = vmatprep.subr.bf16.mxu1 %v2834_v57  ;;  %v611_v55 = vld [vmem:[%s3062_s6 + $0x30] sm:$0x11]  ;;  %v634_v56 = vshll.u32 %v607_v53, 16  ;;  %v608_v57 = vld [vmem:[%s3062_s6 + $0x18] sm:$0x11] }
  0x2f   : > { %544 = vmatmul.mubr.bf16.gmra.mrb[4].mxu0 %v2183_v26  ;;  %v662_v60 = vshll.u32 %v611_v55, 16  ;;  %v648_v62 = vshll.u32 %v608_v57, 16  ;;  %v2863_v26 = vld [vmem:[%s3511_s1 + $0x208] sm:$0xff]   ;;  %v2867_v53 = vld [vmem:[%s3511_s1 + $0x210] sm:$0xff]  }
  0x30   : > { %2621 = vmatpush3.bf16.msra.mxu0 %v2835_v59  ;;  %593 = vmatmul.mubr.bf16.gmra.mrb[4].mxu1 %v2185_v31  ;;  %v615_v31 = vld [vmem:[%s3062_s6 + $0x50] sm:$0x11] }
  0x31   : > { %2649 = vmatpush3.bf16.msra.mxu1 %v2836_v61  ;;  %2622 = vmatprep.subr.bf16.mxu0 %v2837_v63  ;;  %v612_v61 = vld [vmem:[%s3062_s6 + $0x38] sm:$0x11]  ;;  %v636_v63 = vrot.slane %v634_v56, 5  ;;  %v650_v4 = vrot.slane %v648_v62, 5  ;;  %v690_v35 = vshll.u32 %v615_v31, 16  ;;  %v2896_v31 = vld [vmem:[%s3511_s1 + $0x388] sm:$0xff]  }
  0x32   : > { %2650 = vmatprep.subr.bf16.mxu1 %v2838_v1  ;;  %v676_v0 = vshll.u32 %v612_v61, 16  ;;  %v2857_v1 = vld [vmem:[%s3511_s1 + $0x240] sm:$0xff]   ;;  %v2396_v61 = vcombine.high %v3072_v33, %v3153_v17 }
  0x33   : > { %v651_v10 = vsel %vm3221_vm2, %v3162_v21, %v650_v4  ;;  %v692_v43 = vrot.slane %v690_v35, 5  ;;  %v2398_v4 = vcombine.high %v3078_v37, %v3167_v24  ;;  %v2330_v35 = vld [vmem:[%s3062_s6 + $0x88] sm:$0xff] }
  0x34   : > { %2623 = vmatpush3.bf16.msra.mxu0 %v2839_v3  ;;  %v664_v3 = vrot.slane %v662_v60, 5  ;;  %v678_v7 = vrot.slane %v676_v0, 5  ;;  %v2869_v60 = vld [vmem:[%s3511_s1 + $0x258] sm:$0xff]   ;;  %v2402_v38 = vcombine.high %v3170_v25, %v2330_v35 }
  0x35   : > { %2651 = vmatpush3.bf16.msra.mxu1 %v2840_v5  ;;  %2624 = vmatprep.subr.bf16.mxu0 %v2841_v6  ;;  %v715_v5 = vor.u32 %v714_v51, %v711_v47  ;;  %v637_v6 = vsel %vm3221_vm2, %v3158_v19, %v636_v63  ;;  %v700_v19 = vrot.slane %v698_v58, 5  ;;  %v693_v51 = vsel %vm3221_vm2, %v3207_v49, %v692_v43  ;;  %v2868_v58 = vld [vmem:[%s3511_s1 + $0x290] sm:$0xff]   ;;  %v2870_v63 = vld [vmem:[%s3511_s1 + $0x2d8] sm:$0xff]  }
  0x36   : > { %2652 = vmatprep.subr.bf16.mxu1 %v2842_v8  ;;  %v2859_v8 = vld [vmem:[%s3511_s1 + $0x200] sm:$0xff]   ;;  %v665_v9 = vsel %vm3221_vm2, %v3160_v20, %v664_v3  ;;  %v2872_v3 = vld [vmem:[%s3511_s1 + $0x298] sm:$0xff]  }
  0x37   : > { %v3256_v23 = vrot.slane %v715_v5, 4  ;;  %v701_v27 = vor.u32 %v700_v19, %v697_v54  ;;  %v2873_v5 = vld [vmem:[%s3511_s1 + $0x260] sm:$0xff]   ;;  %v2885_v19 = vld [vmem:[%s3511_s1 + $0x278] sm:$0xff]  }
  0x38   : > { %2625 = vmatpush3.bf16.msra.mxu0 %v2843_v13  ;;  %v2283_v13 = vcombine.low %v637_v6, %v665_v9  ;;  %v2901_v43 = vld [vmem:[%s3511_s1 + $0x358] sm:$0xff]  }
  0x39   : > { %2653 = vmatpush3.bf16.msra.mxu1 %v2844_v14  ;;  %2626 = vmatprep.subr.bf16.mxu0 %v2845_v15  ;;  %v2284_v14 = vcombine.high %v637_v6, %v665_v9  ;;  %v679_v15 = vsel %vm3221_vm2, %v674_v40, %v678_v7  ;;  %v2874_v6 = vld [vmem:[%s3511_s1 + $0x2e0] sm:$0xff]   ;;  %v2877_v9 = vld [vmem:[%s3511_s1 + $0x268] sm:$0xff]  }
  0x3a   : > { %2654 = vmatprep.subr.bf16.mxu1 %v2846_v16  ;;  %v2861_v16 = vld [vmem:[%s3511_s1 + $0x248] sm:$0xff]   ;;  %v2285_v20 = vcombine.low %v651_v10, %v679_v15  ;;  %v2286_v21 = vcombine.high %v651_v10, %v679_v15  ;;  %v2875_v7 = vld [vmem:[%s3511_s1 + $0x220] sm:$0xff]   ;;  %v2883_v15 = vld [vmem:[%s3511_s1 + $0x230] sm:$0xff]  }
  0x3b   : > { %1057 = vmatprep.mubr.bf16.mxu0 %v2284_v14  ;;  %v2878_v10 = vld [vmem:[%s3511_s1 + $0x2e8] sm:$0xff]   ;;  %v2882_v14 = vld [vmem:[%s3511_s1 + $0x2f0] sm:$0xff]  }
  0x3c   : > { %2627 = vmatpush3.bf16.msra.mxu0 %v2847_v30  ;;  %1106 = vmatprep.mubr.bf16.mxu1 %v2286_v21  ;;  %v725_v30 = vrot.slane %v723_v12, 4  ;;  %v2880_v12 = vld [vmem:[%s3511_s1 + $0x2a8] sm:$0xff]   ;;  %v2887_v21 = vld [vmem:[%s3511_s1 + $0x238] sm:$0xff]  }
  0x3d   : > { %2655 = vmatpush3.bf16.msra.mxu1 %v2848_v34  ;;  %2628 = vmatprep.subr.bf16.mxu0 %v2849_v36  ;;  %v616_v34 = vld [vmem:[%s3062_s6 + $0x58] sm:$0x11]  ;;  %v718_v36 = vshll.u32 %v619_v32, 16  ;;  %v2329_v32 = vld [vmem:[%s3062_s6 + $0x80] sm:$0xff] }
  0x3e   : > { %2656 = vmatprep.subr.bf16.mxu1 %v2850_v39  ;;  %v3269_v39 = vrot.slane %v701_v27, 4  ;;  %v704_v40 = vshll.u32 %v616_v34, 16  ;;  %v2889_v27 = vld [vmem:[%s3511_s1 + $0x340] sm:$0xff]   ;;  %v2400_v34 = vcombine.high %v3156_v18, %v2329_v32 }
  0x40   : > { %2629 = vmatpush3.bf16.msra.mxu0 %v2851_v41  ;;  %v728_v41 = vrot.slane %v726_v28, 5  ;;  %v706_v45 = vrot.slane %v704_v40, 5  ;;  %v2397_v28 = vcombine.low %v3078_v37, %v3167_v24  ;;  %v2893_v37 = vld [vmem:[%s3511_s1 + $0x348] sm:$0xff]   ;;  %v2401_v40 = vcombine.low %v3170_v25, %v2330_v35  ;;  %v2900_v25 = vld [vmem:[%s3511_s1 + $0x390] sm:$0xff]  }
  0x41   : > { %2657 = vmatpush3.bf16.msra.mxu1 %v2852_v44  ;;  %2630 = vmatprep.subr.bf16.mxu0 %v2853_v46  ;;  %v720_v44 = vrot.slane %v718_v36, 5  ;;  %v2865_v46 = vld [vmem:[%s3511_s1 + $0x250] sm:$0xff]   ;;  %v2894_v24 = vld [vmem:[%s3511_s1 + $0x3c8] sm:$0xff]   ;;  %v2399_v36 = vcombine.low %v3156_v18, %v2329_v32 }
  0x42   : > { %2658 = vmatprep.subr.bf16.mxu1 %v2854_v48  ;;  %v729_v47 = vor.u32 %v728_v41, %v725_v30  ;;  %v734_v48 = vrot.slane %v732_v42, 5  ;;  %v707_v55 = vsel %vm3221_vm2, %v3269_v39, %v706_v45  ;;  %v2895_v30 = vld [vmem:[%s3511_s1 + $0x308] sm:$0xff]   ;;  %v2897_v41 = vld [vmem:[%s3511_s1 + $0x350] sm:$0xff]   ;;  %v2903_v45 = vld [vmem:[%s3511_s1 + $0x318] sm:$0xff]  }
  0x43   : > { %v2898_v42 = vld [vmem:[%s3511_s1 + $0x3d0] sm:$0xff]  }
  0x44   : > { %2631 = vmatpush3.bf16.msra.mxu0 %v2855_v50  ;;  %v2866_v50 = vld [vmem:[%s3511_s1 + $0x2d0] sm:$0xff]   ;;  %v3289_v56 = vrot.slane %v729_v47, 4  ;;  %v2905_v47 = vld [vmem:[%s3511_s1 + $0x360] sm:$0xff]  }
  0x45   : > { %2659 = vmatpush3.bf16.msra.mxu1 %v2856_v52  ;;  %2672 = vmatprep.subr.bf16.mxu0 %v2857_v1  ;;  %v721_v52 = vsel %vm3221_vm2, %v3256_v23, %v720_v44  ;;  %v2899_v18 = vld [vmem:[%s3511_s1 + $0x310] sm:$0xff]   ;;  %v2902_v44 = vld [vmem:[%s3511_s1 + $0x3d8] sm:$0xff]  }
  0x46   : > { %2700 = vmatprep.subr.bf16.mxu1 %v2858_v2  ;;  %v2288_v54 = vcombine.high %v693_v51, %v721_v52  ;;  %v2287_v57 = vcombine.low %v693_v51, %v721_v52  ;;  %v735_v62 = vsel %vm3221_vm2, %v3289_v56, %v734_v48  ;;  %v2871_v2 = vld [vmem:[%s3511_s1 + $0x218] sm:$0xff]   ;;  %v2906_v48 = vld [vmem:[%s3511_s1 + $0x3e0] sm:$0xff]   ;;  %v1652_v51 = vshrl.u32 %v2329_v32, 16 }
  0x47   : > { %1058 = vmatmul.mubr.bf16.vlgmr.msra.gmra.mrb[8].mxu0 %v2283_v13  ;;  %v2290_v0 = vcombine.high %v707_v55, %v735_v62  ;;  %v2289_v1 = vcombine.low %v707_v55, %v735_v62  ;;  %v2881_v13 = vld [vmem:[%s3511_s1 + $0x270] sm:$0xff]   ;;  %v2908_v52 = vld [vmem:[%s3511_s1 + $0x3a0] sm:$0xff]   ;;  %v2910_v55 = vld [vmem:[%s3511_s1 + $0x3e8] sm:$0xff]  }
  0x48   : > { %1107 = vmatmul.mubr.bf16.vlgmr.msra.gmra.mrb[8].mxu1 %v2285_v20  ;;  %2673 = vmatpush3.bf16.msra.mxu0 %v2859_v8  ;;  %v2876_v8 = vld [vmem:[%s3511_s1 + $0x2a0] sm:$0xff]   ;;  %v2886_v20 = vld [vmem:[%s3511_s1 + $0x2f8] sm:$0xff]   ;;  %v2913_v62 = vld [vmem:[%s3511_s1 + $0x370] sm:$0xff]  }
  0x49   : > { %2701 = vmatpush3.bf16.msra.mxu1 %v2860_v11  ;;  %2674 = vmatprep.subr.bf16.mxu0 %v2861_v16  ;;  %v2879_v11 = vld [vmem:[%s3511_s1 + $0x228] sm:$0xff]   ;;  %v2884_v16 = vld [vmem:[%s3511_s1 + $0x2b0] sm:$0xff]  }
  0x4a   : > { %2702 = vmatprep.subr.bf16.mxu1 %v2862_v22  ;;  %1065 = vmatprep.mubr.bf16.mxu0 %v2288_v54  ;;  %v2888_v22 = vld [vmem:[%s3511_s1 + $0x2b8] sm:$0xff]   ;;  %v2909_v54 = vld [vmem:[%s3511_s1 + $0x368] sm:$0xff]  }
  0x4b   : > { %1114 = vmatprep.mubr.bf16.mxu1 %v2290_v0  ;;  %v2914_v0 = vld [vmem:[%s3511_s1 + $0x3f0] sm:$0xff]  }
  0x4c   : > { %2675 = vmatpush3.bf16.msra.mxu0 %v2863_v26  ;;  %v2395_v26 = vcombine.low %v3072_v33, %v3153_v17  ;;  %v2891_v33 = vld [vmem:[%s3511_s1 + $0x300] sm:$0xff]  }
  0x4d   : > { %2703 = vmatpush3.bf16.msra.mxu1 %v2864_v29  ;;  %2676 = vmatprep.subr.bf16.mxu0 %v2865_v46  ;;  %v2890_v29 = vld [vmem:[%s3511_s1 + $0x3c0] sm:$0xff]   ;;  %v2904_v46 = vld [vmem:[%s3511_s1 + $0x398] sm:$0xff]  }
  0x4e   : > { %2704 = vmatprep.subr.bf16.mxu1 %v2866_v50  ;;  %v2892_v17 = vld [vmem:[%s3511_s1 + $0x380] sm:$0xff]  }
  0x4f   : > { %1066 = vmatmul.mubr.bf16.gmra.mrb[12].mxu0 %v2287_v57  ;;  %v2907_v50 = vld [vmem:[%s3511_s1 + $0x320] sm:$0xff]   ;;  %v2911_v57 = vld [vmem:[%s3511_s1 + $0x328] sm:$0xff]  }
  0x50   : > { %2677 = vmatpush3.bf16.msra.mxu0 %v2867_v53  ;;  %1473 = vmatprep.mubr.bf16.mxu0 %v2396_v61  ;;  %v1655_v53 = vshll.u32 %v2329_v32, 16 }
  0x51   : > { %2705 = vmatpush3.bf16.msra.mxu1 %v2868_v58  ;;  %2678 = vmatprep.subr.bf16.mxu0 %v2869_v60  ;;  %v1654_v58 = vrot.slane %v1652_v51, 4  ;;  %v2912_v60 = vld [vmem:[%s3511_s1 + $0x3a8] sm:$0xff]  }
  0x52   : > { %2706 = vmatprep.subr.bf16.mxu1 %v2870_v63  ;;  %1115 = vmatmul.mubr.bf16.gmra.mrb[12].mxu1 %v2289_v1  ;;  %v1657_v61 = vrot.slane %v1655_v53, 5  ;;  %v1666_v63 = vshrl.u32 %v2330_v35, 16  ;;  %v1669_v1 = vshll.u32 %v2330_v35, 16  ;;  %v2449_v35 = vld [vmem:[%s3062_s6 + $0x90] sm:$0x11] }
  0x53   : > { %1522 = vmatprep.mubr.bf16.mxu1 %v2398_v4 }
  0x54   : > { %2679 = vmatpush3.bf16.msra.mxu0 %v2871_v2  ;;  %v2915_v2 = vld [vmem:[%s3511_s1 + $0x330] sm:$0xff]   ;;  %v1658_v4 = vor.u32 %v1657_v61, %v1654_v58 }
  0x55   : > { %2707 = vmatpush3.bf16.msra.mxu1 %v2872_v3  ;;  %2680 = vmatprep.subr.bf16.mxu0 %v2873_v5  ;;  %v2916_v3 = vld [vmem:[%s3511_s1 + $0x3b0] sm:$0xff]   ;;  %v2917_v5 = vld [vmem:[%s3511_s1 + $0x378] sm:$0xff]  }
  0x56   : > { %2708 = vmatprep.subr.bf16.mxu1 %v2874_v6  ;;  %v1668_v6 = vrot.slane %v1666_v63, 4 }
  0x58   : > { %2681 = vmatpush3.bf16.msra.mxu0 %v2875_v7  ;;  %v2918_v7 = vld [vmem:[%s3511_s1 + $0x3f8] sm:$0xff]  }
  0x59   : > { %2709 = vmatpush3.bf16.msra.mxu1 %v2876_v8  ;;  %2682 = vmatprep.subr.bf16.mxu0 %v2877_v9  ;;  %v1671_v8 = vrot.slane %v1669_v1, 5  ;;  %v2919_v9 = vld [vmem:[%s3511_s1 + $0x338] sm:$0xff]  }
  0x5a   : > { %2710 = vmatprep.subr.bf16.mxu1 %v2878_v10  ;;  %v2920_v10 = vld [vmem:[%s3511_s1 + $0x3b8] sm:$0xff]  }
  0x5c   : > { %2683 = vmatpush3.bf16.msra.mxu0 %v2879_v11  ;;  %v2435_v11 = vld [vmem:[%s3062_s6 + $0x20] sm:$0xff] }
  0x5d   : > { %2711 = vmatpush3.bf16.msra.mxu1 %v2880_v12  ;;  %2684 = vmatprep.subr.bf16.mxu0 %v2881_v13  ;;  %v2437_v12 = vld [vmem:[%s3062_s6 + $0x30] sm:$0x11]  ;;  %v1659_v13 = vrot.slane %v1658_v4, 4 }
  0x5e   : > { %2712 = vmatprep.subr.bf16.mxu1 %v2882_v14  ;;  %v2441_v14 = vld [vmem:[%s3062_s6 + $0x50] sm:$0x11] }
  0x60   : > { %2685 = vmatpush3.bf16.msra.mxu0 %v2883_v15  ;;  %v1568_v15 = vshrl.u32 %v2435_v11, 16 }
  0x61   : > { %2713 = vmatpush3.bf16.msra.mxu1 %v2884_v16  ;;  %2686 = vmatprep.subr.bf16.mxu0 %v2885_v19  ;;  %v1571_v16 = vshll.u32 %v2435_v11, 16  ;;  %v1577_v19 = vshll.u32 %v2437_v12, 16 }
  0x62   : > { %2714 = vmatprep.subr.bf16.mxu1 %v2886_v20  ;;  %v2436_v20 = vld [vmem:[%s3062_s6 + $0x28] sm:$0xff] }
  0x64   : > { %2687 = vmatpush3.bf16.msra.mxu0 %v2887_v21  ;;  %v1605_v21 = vshll.u32 %v2441_v14, 16 }
  0x65   : > { %2715 = vmatpush3.bf16.msra.mxu1 %v2888_v22  ;;  %2728 = vmatprep.subr.bf16.mxu0 %v2889_v27  ;;  %v2438_v22 = vld [vmem:[%s3062_s6 + $0x38] sm:$0x11]  ;;  %v1582_v27 = vshrl.u32 %v2436_v20, 16 }
  0x66   : > { %2756 = vmatprep.subr.bf16.mxu1 %v2890_v29  ;;  %v1570_v29 = vrot.slane %v1568_v15, 4  ;;  %v1591_v32 = vshll.u32 %v2438_v22, 16 }
  0x67   : > { %1474 = vmatmul.mubr.bf16.vlgmr.msra.gmra.mrb[16].mxu0 %v2395_v26  ;;  %v2442_v26 = vld [vmem:[%s3062_s6 + $0x58] sm:$0x11] }
  0x68   : > { %1523 = vmatmul.mubr.bf16.vlgmr.msra.gmra.mrb[16].mxu1 %v2397_v28  ;;  %2729 = vmatpush3.bf16.msra.mxu0 %v2891_v33  ;;  %v1672_v28 = vor.u32 %v1671_v8, %v1668_v6  ;;  %v1573_v33 = vrot.slane %v1571_v16, 5 }
  0x69   : > { %2757 = vmatpush3.bf16.msra.mxu1 %v2892_v17  ;;  %2730 = vmatprep.subr.bf16.mxu0 %v2893_v37  ;;  %v1579_v17 = vrot.slane %v1577_v19, 5  ;;  %v1585_v37 = vshll.u32 %v2436_v20, 16 }
  0x6a   : > { %2758 = vmatprep.subr.bf16.mxu1 %v2894_v24  ;;  %1481 = vmatprep.mubr.bf16.mxu0 %v2400_v34  ;;  %v2445_v24 = vld [vmem:[%s3062_s6 + $0x70] sm:$0x11]  ;;  %v1619_v34 = vshll.u32 %v2442_v26, 16  ;;  %v1673_v53 = vrot.slane %v1672_v28, 4 }
  0x6b   : > { %1530 = vmatprep.mubr.bf16.mxu1 %v2402_v38  ;;  %v1587_v38 = vrot.slane %v1585_v37, 5 }
  0x6c   : > { %2731 = vmatpush3.bf16.msra.mxu0 %v2895_v30  ;;  %v1607_v30 = vrot.slane %v1605_v21, 5 }
  0x6d   : > { %2759 = vmatpush3.bf16.msra.mxu1 %v2896_v31  ;;  %2732 = vmatprep.subr.bf16.mxu0 %v2897_v41  ;;  %v1584_v31 = vrot.slane %v1582_v27, 4  ;;  %v1661_v41 = vshll.u32 %v2449_v35, 16 }
  0x6e   : > { %2760 = vmatprep.subr.bf16.mxu1 %v2898_v42  ;;  %v2446_v42 = vld [vmem:[%s3062_s6 + $0x78] sm:$0x11] }
  0x6f   : > { %1482 = vmatmul.mubr.bf16.gmra.mrb[20].mxu0 %v2399_v36  ;;  %v1574_v36 = vor.u32 %v1573_v33, %v1570_v29 }
  0x70   : > { %1531 = vmatmul.mubr.bf16.gmra.mrb[20].mxu1 %v2401_v40  ;;  %2733 = vmatpush3.bf16.msra.mxu0 %v2899_v18  ;;  %v1633_v40 = vshll.u32 %v2445_v24, 16  ;;  %v1608_v18 = vsel %vm3221_vm2, %v3207_v49, %v1607_v30 }
  0x71   : > { %2761 = vmatpush3.bf16.msra.mxu1 %v2900_v25  ;;  %2734 = vmatprep.subr.bf16.mxu0 %v2901_v43  ;;  %v1593_v25 = vrot.slane %v1591_v32, 5  ;;  %v1621_v43 = vrot.slane %v1619_v34, 5 }
  0x72   : > { %2762 = vmatprep.subr.bf16.mxu1 %v2902_v44  ;;  %v2450_v44 = vld [vmem:[%s3062_s6 + $0x98] sm:$0x11] }
  0x73   : > { %v1622_v51 = vsel %vm3221_vm2, %v3269_v39, %v1621_v43 }
  0x74   : > { %2735 = vmatpush3.bf16.msra.mxu0 %v2903_v45  ;;  %v1647_v45 = vshll.u32 %v2446_v42, 16 }
  0x75   : > { %2763 = vmatpush3.bf16.msra.mxu1 %v2904_v46  ;;  %2736 = vmatprep.subr.bf16.mxu0 %v2905_v47  ;;  %v1575_v46 = vrot.slane %v1574_v36, 4  ;;  %v1588_v47 = vor.u32 %v1587_v38, %v1584_v31 }
  0x76   : > { %2764 = vmatprep.subr.bf16.mxu1 %v2906_v48  ;;  %v1635_v48 = vrot.slane %v1633_v40, 5 }
  0x78   : > { %2737 = vmatpush3.bf16.msra.mxu0 %v2907_v50  ;;  %v1663_v50 = vrot.slane %v1661_v41, 5  ;;  %v1636_v49 = vsel %vm3221_vm2, %v3256_v23, %v1635_v48 }
  0x79   : > { %2765 = vmatpush3.bf16.msra.mxu1 %v2908_v52  ;;  %2738 = vmatprep.subr.bf16.mxu0 %v2909_v54  ;;  %v1649_v52 = vrot.slane %v1647_v45, 5  ;;  %v1675_v54 = vshll.u32 %v2450_v44, 16 }
  0x7a   : > { %2766 = vmatprep.subr.bf16.mxu1 %v2910_v55  ;;  %v1580_v55 = vsel %vm3221_vm2, %v1575_v46, %v1579_v17  ;;  %v1664_v58 = vsel %vm3221_vm2, %v1659_v13, %v1663_v50 }
  0x7b   : > { %v2516_v61 = vcombine.high %v1580_v55, %v1608_v18  ;;  %v1650_v63 = vsel %vm3221_vm2, %v3289_v56, %v1649_v52  ;;  %v2519_v4 = vcombine.low %v1636_v49, %v1664_v58 }
  0x7c   : > { %2739 = vmatpush3.bf16.msra.mxu0 %v2911_v57  ;;  %v1589_v57 = vrot.slane %v1588_v47, 4 }
  0x7d   : > { %2767 = vmatpush3.bf16.msra.mxu1 %v2912_v60  ;;  %2740 = vmatprep.subr.bf16.mxu0 %v2913_v62  ;;  %v2515_v60 = vcombine.low %v1580_v55, %v1608_v18  ;;  %v2520_v62 = vcombine.high %v1636_v49, %v1664_v58 }
  0x7e   : > { %2768 = vmatprep.subr.bf16.mxu1 %v2914_v0  ;;  %v1594_v39 = vsel %vm3221_vm2, %v1589_v57, %v1593_v25  ;;  %v1677_v0 = vrot.slane %v1675_v54, 5  ;;  %2000 = vmatprep.mubr.bf16.mxu0 %v2516_v61 }
  0x7f   : > { %v2517_v1 = vcombine.low %v1594_v39, %v1622_v51 }
  0x80   : > { %2741 = vmatpush3.bf16.msra.mxu0 %v2915_v2  ;;  %v2518_v2 = vcombine.high %v1594_v39, %v1622_v51  ;;  %v1678_v23 = vsel %vm3221_vm2, %v1673_v53, %v1677_v0 }
  0x81   : > { %2769 = vmatpush3.bf16.msra.mxu1 %v2916_v3  ;;  %2742 = vmatprep.subr.bf16.mxu0 %v2917_v5  ;;  %v2522_v3 = vcombine.high %v1650_v63, %v1678_v23  ;;  %v2521_v5 = vcombine.low %v1650_v63, %v1678_v23 }
  0x82   : > { %2770 = vmatprep.subr.bf16.mxu1 %v2918_v7  ;;  %2049 = vmatprep.mubr.bf16.mxu1 %v2518_v2 }
  0x84   : > { %2743 = vmatpush3.bf16.msra.mxu0 %v2919_v9 }
  0x85   : > { %2771 = vmatpush3.bf16.msra.mxu1 %v2920_v10 }
  0x87   : > { %2001 = vmatmul.mubr.bf16.vlgmr.msra.gmra.mrb[24].mxu0 %v2515_v60 }
  0x88   : > { %2008 = vmatprep.mubr.bf16.mxu0 %v2520_v62  ;;  %2050 = vmatmul.mubr.bf16.vlgmr.msra.gmra.mrb[24].mxu1 %v2517_v1 }
  0x89   : > { %2057 = vmatprep.mubr.bf16.mxu1 %v2522_v3 }
  0x8f   : > { %2009 = vmatmul.mubr.bf16.gmra.mrb[28].mxu0 %v2519_v4 }
  0x90   : > { %2058 = vmatmul.mubr.bf16.gmra.mrb[28].mxu1 %v2521_v5 }
  0xfa   : > { %v2576_v6 = vpop.f32.mrb[0].mxu0 }
  0xfb   : > { %v2604_v7 = vpop.f32.mrb[0].mxu1  ;;  %v2577_v56 = vpop.f32.mrb[1].mxu0 }
  0xfc   : > { %v2578_v8 = vadd.f32 %v2577_v56, %v2576_v6  ;;  %v2605_v9 = vpop.f32.mrb[1].mxu1  ;;  %v2579_v10 = vpop.f32.mrb[2].mxu0 }
  0xfd   : > { %v2606_v11 = vadd.f32 %v2605_v9, %v2604_v7  ;;  %v2607_v12 = vpop.f32.mrb[2].mxu1  ;;  %v2580_v13 = vpop.f32.mrb[3].mxu0 }
  0xfe   : > { %v2581_v59 = vadd.f32 %v2580_v13, %v2579_v10  ;;  %v2608_v14 = vpop.f32.mrb[3].mxu1 }
  0xff   : > { %v587_v15 = vadd.f32 %v2606_v11, %v2578_v8  ;;  %v2609_v16 = vadd.f32 %v2608_v14, %v2607_v12 }
 0x101   : > { %v590_v19 = vadd.f32 %v2609_v16, %v2581_v59 }
 0x102   : > { %v2582_v20 = vpop.f32.mrb[4].mxu0 }
 0x103   : > { %v2610_v21 = vpop.f32.mrb[4].mxu1  ;;  %v2583_v22 = vpop.f32.mrb[5].mxu0 }
 0x104   : > { %v2584_v26 = vadd.f32 %v2583_v22, %v2582_v20  ;;  %v2611_v27 = vpop.f32.mrb[5].mxu1  ;;  %v2585_v28 = vpop.f32.mrb[6].mxu0 }
 0x105   : > { %v2612_v29 = vadd.f32 %v2611_v27, %v2610_v21  ;;  %v2613_v33 = vpop.f32.mrb[6].mxu1  ;;  %v2586_v17 = vpop.f32.mrb[7].mxu0 }
 0x106   : > { %v2587_v37 = vadd.f32 %v2586_v17, %v2585_v28  ;;  %v2614_v24 = vpop.f32.mrb[7].mxu1 }
 0x107   : > { %v595_v30 = vadd.f32 %v2612_v29, %v2584_v26  ;;  %v2615_v31 = vadd.f32 %v2614_v24, %v2613_v33 }
 0x109   : > { %v598_v32 = vadd.f32 %v2615_v31, %v2587_v37 }
 0x11a   : > { %v2632_v34 = vpop.f32.mrb[8].mxu0 }
 0x11b   : > { %v2660_v35 = vpop.f32.mrb[8].mxu1  ;;  %v2633_v36 = vpop.f32.mrb[9].mxu0 }
 0x11c   : > { %v2634_v38 = vadd.f32 %v2633_v36, %v2632_v34  ;;  %v2661_v40 = vpop.f32.mrb[9].mxu1  ;;  %v2635_v41 = vpop.f32.mrb[10].mxu0 }
 0x11d   : > { %v2662_v42 = vadd.f32 %v2661_v40, %v2660_v35  ;;  %v2663_v18 = vpop.f32.mrb[10].mxu1  ;;  %v2636_v25 = vpop.f32.mrb[11].mxu0 }
 0x11e   : > { %v2637_v43 = vadd.f32 %v2636_v25, %v2635_v41  ;;  %v2664_v44 = vpop.f32.mrb[11].mxu1 }
 0x11f   : > { %v1109_v45 = vadd.f32 %v2662_v42, %v2634_v38  ;;  %v2665_v46 = vadd.f32 %v2664_v44, %v2663_v18 }
 0x121   : > { %v1127_v47 = vadd.f32 %v1109_v45, %v587_v15  ;;  %v1112_v48 = vadd.f32 %v2665_v46, %v2637_v43 }
 0x122   : > { %v2638_v51 = vpop.f32.mrb[12].mxu0 }
 0x123   : > { %v1128_v50 = vadd.f32 %v1112_v48, %v590_v19  ;;  %v2639_v52 = vpop.f32.mrb[13].mxu0 }
 0x124   : > { %v2640_v53 = vadd.f32 %v2639_v52, %v2638_v51  ;;  %v2641_v54 = vpop.f32.mrb[14].mxu0  ;;  %v2556_v52 = vld [vmem:[%s3513_s3] ss:$0 sm:$0xff] }
 0x125   : > { %v2666_v55 = vpop.f32.mrb[12].mxu1  ;;  %v2642_v57 = vpop.f32.mrb[15].mxu0 }
 0x126   : > { %v2667_v49 = vpop.f32.mrb[13].mxu1  ;;  %v2643_v58 = vadd.f32 %v2642_v57, %v2641_v54 }
 0x127   : > { %v2668_v60 = vadd.f32 %v2667_v49, %v2666_v55  ;;  %v2669_v61 = vpop.f32.mrb[14].mxu1 }
 0x128   : > { %v2670_v62 = vpop.f32.mrb[15].mxu1 }
 0x129   : > { %v1117_v39 = vadd.f32 %v2668_v60, %v2640_v53  ;;  %v2671_v63 = vadd.f32 %v2670_v62, %v2669_v61 }
 0x12b   : > { %v1129_v0 = vadd.f32 %v1117_v39, %v595_v30  ;;  %v1120_v1 = vadd.f32 %v2671_v63, %v2643_v58 }
 0x12d   : > { %v1130_v2 = vadd.f32 %v1120_v1, %v598_v32 }
 0x13a   : > { %v2688_v23 = vpop.f32.mrb[16].mxu0 }
 0x13b   : > { %v2716_v3 = vpop.f32.mrb[16].mxu1  ;;  %v2689_v4 = vpop.f32.mrb[17].mxu0 }
 0x13c   : > { %v2690_v5 = vadd.f32 %v2689_v4, %v2688_v23  ;;  %v2717_v6 = vpop.f32.mrb[17].mxu1  ;;  %v2691_v7 = vpop.f32.mrb[18].mxu0 }
 0x13d   : > { %v2718_v56 = vadd.f32 %v2717_v6, %v2716_v3  ;;  %v2719_v8 = vpop.f32.mrb[18].mxu1  ;;  %v2692_v9 = vpop.f32.mrb[19].mxu0 }
 0x13e   : > { %v2693_v10 = vadd.f32 %v2692_v9, %v2691_v7  ;;  %v2720_v11 = vpop.f32.mrb[19].mxu1 }
 0x13f   : > { %v1525_v12 = vadd.f32 %v2718_v56, %v2690_v5  ;;  %v2721_v13 = vadd.f32 %v2720_v11, %v2719_v8 }
 0x141   : > { %v1543_v59 = vadd.f32 %v1525_v12, %v1127_v47  ;;  %v1528_v14 = vadd.f32 %v2721_v13, %v2693_v10  ;;  %v2555_v47 = vld [vmem:[%s3512_s2] ss:$0 sm:$0xff] }
 0x142   : > { %v2694_v15 = vpop.f32.mrb[20].mxu0 }
 0x143   : > { %v1544_v16 = vadd.f32 %v1528_v14, %v1128_v50  ;;  %v2722_v19 = vpop.f32.mrb[20].mxu1  ;;  %v2695_v20 = vpop.f32.mrb[21].mxu0 }
 0x144   : > { %v2696_v21 = vadd.f32 %v2695_v20, %v2694_v15  ;;  %v2723_v22 = vpop.f32.mrb[21].mxu1  ;;  %v2697_v26 = vpop.f32.mrb[22].mxu0 }
 0x145   : > { %v2724_v27 = vadd.f32 %v2723_v22, %v2722_v19  ;;  %v2725_v28 = vpop.f32.mrb[22].mxu1  ;;  %v2698_v29 = vpop.f32.mrb[23].mxu0 }
 0x146   : > { %v2699_v33 = vadd.f32 %v2698_v29, %v2697_v26  ;;  %v2726_v17 = vpop.f32.mrb[23].mxu1 }
 0x147   : > { %v1533_v37 = vadd.f32 %v2724_v27, %v2696_v21  ;;  %v2727_v24 = vadd.f32 %v2726_v17, %v2725_v28 }
 0x149   : > { %v1545_v30 = vadd.f32 %v1533_v37, %v1129_v0  ;;  %v1536_v31 = vadd.f32 %v2727_v24, %v2699_v33 }
 0x14b   : > { %v1546_v32 = vadd.f32 %v1536_v31, %v1130_v2 }
 0x15a   : > { %v2744_v34 = vpop.f32.mrb[24].mxu0 }
 0x15b   : > { %v2745_v35 = vpop.f32.mrb[25].mxu0  ;;  %v2772_v36 = vpop.f32.mrb[24].mxu1 }
 0x15c   : > { %v2746_v38 = vadd.f32 %v2745_v35, %v2744_v34  ;;  %v2747_v40 = vpop.f32.mrb[26].mxu0  ;;  %v2773_v41 = vpop.f32.mrb[25].mxu1 }
 0x15d   : > { %v2748_v42 = vpop.f32.mrb[27].mxu0  ;;  %v2774_v18 = vadd.f32 %v2773_v41, %v2772_v36  ;;  %v2775_v25 = vpop.f32.mrb[26].mxu1 }
 0x15e   : > { %v2749_v43 = vadd.f32 %v2748_v42, %v2747_v40  ;;  %v2776_v44 = vpop.f32.mrb[27].mxu1 }
 0x15f   : > { %v2052_v45 = vadd.f32 %v2774_v18, %v2746_v38  ;;  %v2777_v46 = vadd.f32 %v2776_v44, %v2775_v25 }
 0x161   : > { %v2070_v48 = vadd.f32 %v2052_v45, %v1543_v59  ;;  %v2055_v50 = vadd.f32 %v2777_v46, %v2749_v43 }
 0x162   : > { %v2750_v51 = vpop.f32.mrb[28].mxu0 }
 0x163   : > { %v2751_v53 = vpop.f32.mrb[29].mxu0  ;;  %v2089_v54 = vmul.f32 %v2555_v47, %v2070_v48  ;;  %v2071_v55 = vadd.f32 %v2055_v50, %v1544_v16  ;;  %v2778_v57 = vpop.f32.mrb[28].mxu1 }
 0x164   : > { %v2752_v49 = vadd.f32 %v2751_v53, %v2750_v51  ;;  %v2753_v58 = vpop.f32.mrb[30].mxu0  ;;  %v2779_v60 = vpop.f32.mrb[29].mxu1 }
 0x165   : > { %v2754_v61 = vpop.f32.mrb[31].mxu0  ;;  %v2100_v62 = vadd.f32 %v2556_v52, %v2089_v54  ;;  %v2090_v39 = vmul.f32 %v2555_v47, %v2071_v55  ;;  %v2780_v63 = vadd.f32 %v2779_v60, %v2778_v57  ;;  %v2781_v0 = vpop.f32.mrb[30].mxu1 }
 0x166   : > { %v2755_v1 = vadd.f32 %v2754_v61, %v2753_v58  ;;  %v2782_v2 = vpop.f32.mrb[31].mxu1 }
 0x167   : > { %v2104_v23 = vmax.f32 %v2100_v62, 0.0  ;;  %v2101_v3 = vadd.f32 %v2556_v52, %v2090_v39  ;;  %v2060_v4 = vadd.f32 %v2780_v63, %v2752_v49  ;;  %v2783_v5 = vadd.f32 %v2782_v2, %v2781_v0 }
 0x169   : > { %v2108_v6 = vpack.c.bf16 %v2104_v23, %v2104_v23  ;;  %v2105_v7 = vmax.f32 %v2101_v3, 0.0  ;;  %v2072_v56 = vadd.f32 %v2060_v4, %v1545_v30  ;;  %v2063_v8 = vadd.f32 %v2783_v5, %v2755_v1 }
 0x16b   : > { %2112 = vst [vmem:[%s197_s27] sm:$0x3] %v2108_v6  ;;  %v2109_v9 = vpack.c.bf16 %v2105_v7, %v2105_v7  ;;  %v2091_v10 = vmul.f32 %v2555_v47, %v2072_v56  ;;  %v2073_v11 = vadd.f32 %v2063_v8, %v1546_v32 }
 0x16d   : > { %2113 = vst [vmem:[%s197_s27 + $0x2] sm:$0x3] %v2109_v9  ;;  %v2102_v12 = vadd.f32 %v2556_v52, %v2091_v10  ;;  %v2092_v13 = vmul.f32 %v2555_v47, %v2073_v11 }
 0x16f   : > { %v2106_v59 = vmax.f32 %v2102_v12, 0.0  ;;  %v2103_v14 = vadd.f32 %v2556_v52, %v2092_v13 }
 0x171   : > { %v2110_v15 = vpack.c.bf16 %v2106_v59, %v2106_v59  ;;  %v2107_v16 = vmax.f32 %v2103_v14, 0.0 }
 0x173   : > { %2114 = vst [vmem:[%s197_s27 + $0x4] sm:$0x3] %v2110_v15  ;;  %v2111_v19 = vpack.c.bf16 %v2107_v16, %v2107_v16 }
 0x175   : > { %2115 = vst [vmem:[%s197_s27 + $0x6] sm:$0x3] %v2111_v19 }
 0x176 PF: > { %s14_s15 = sadd.s32 1, %s2927_s15  }
 0x177   : > { %p11_p4 = scmp.ge.s32.totalorder %s14_s15, 4  }
 0x179   :  { %13 = sbr.rel (!%p11_p4) target bundleno = 1 (0x1), region = 70 }

</bundles_post_ra>
